<compile_context>
chip_gen: v5e
topology: v5e:2x2
jax: 0.10.0
libtpu: 0.0.40
codegen_flags: <defaults>
</compile_context>

<pallas_src>
import jax
import jax.numpy as jnp
import numpy as np
from jax.experimental import pallas as pl
from jax.experimental.pallas import tpu as pltpu


_LANE = 128  # TPU lane width: keep matmul N / K dims lane-dense.


def _round_up(x, m):
    return (x + m - 1) // m * m


# ----------------------------- Pallas kernel --------------------------------
def _darknet_conv_kernel(xm_ref, xh0_ref, xh1_ref, w_ref, b_ref, o_ref,
                         patch_ref):
    """One (batch, H-tile) step of 3x3/s1/p1 conv + folded BN + LeakyReLU(0.1).

    xm_ref:    (1, TH, W_in, Cin)   bf16 main tile rows (padded rows [h*TH, h*TH+TH))
    xh0_ref:   (1, 1,  W_in, Cin)   bf16 halo row 0 (padded row h*TH+TH)
    xh1_ref:   (1, 1,  W_in, Cin)   bf16 halo row 1 (padded row h*TH+TH+1)
    w_ref:     (K_pad, Cout_p)      bf16 BN-scale-folded weights, im2col order
    b_ref:     (1, Cout_p)          f32 folded BN bias
    o_ref:     (1, TH, W_p, Cout)   output tile (unpadded channels)
    patch_ref: (TH, W_p, K_pad)     bf16 im2col scratch (VMEM)
    """
    TH = o_ref.shape[1]
    Wp = o_ref.shape[2]
    Cout = o_ref.shape[3]
    Cin = xm_ref.shape[3]
    Kp = w_ref.shape[0]
    Cout_p = w_ref.shape[1]

    # --- im2col: write the 9 shifted taps ONCE into VMEM scratch -------------
    # Output row i with tap dy needs window row i+dy; window rows [0, TH) come
    # from the main block, rows TH / TH+1 from the two halo rows.
    for dy in range(3):
        for dx in range(3):
            c0 = (dy * 3 + dx) * Cin
            n_main = TH - dy
            if n_main > 0:
                patch_ref[0:n_main, :, c0:c0 + Cin] = (
                    xm_ref[0, dy:dy + n_main, dx:dx + Wp, :])
            if 1 <= dy <= TH:                     # halo row 0 feeds row TH-dy
                r = TH - dy
                patch_ref[r:r + 1, :, c0:c0 + Cin] = (
                    xh0_ref[0, 0:1, dx:dx + Wp, :])
            if dy == 2:                           # halo row 1 feeds row TH-1
                r = TH - 1
                patch_ref[r:r + 1, :, c0:c0 + Cin] = (
                    xh1_ref[0, 0:1, dx:dx + Wp, :])

    # Zero the K tail so uninitialized scratch (x) * zero-weight never NaN-pollutes.
    n_real = 9 * Cin
    if Kp > n_real:
        patch_ref[:, :, n_real:] = jnp.zeros((TH, Wp, Kp - n_real),
                                             patch_ref.dtype)

    # Single deep-K bf16 MXU matmul, f32 accumulation.
    patch = patch_ref[...].reshape(TH * Wp, Kp)
    acc = jnp.dot(patch, w_ref[...], preferred_element_type=jnp.float32)

    # Epilogue in f32: BN scale folded into weights -> bias + LeakyReLU(0.1).
    y = acc + b_ref[0, :]
    y = jnp.where(y > 0, y, 0.1 * y)
    y = y.reshape(1, TH, Wp, Cout_p)
    if Cout_p != Cout:
        y = y[:, :, :, :Cout]
    o_ref[...] = y.astype(o_ref.dtype)


# ----------------------------- sizing helpers --------------------------------
def _vmem_limit_bytes():
    """Generation-aware scoped-VMEM request (~3/4 of capacity, 32..100 MiB)."""
    try:
        cap = int(pltpu.get_tpu_info().vmem_capacity_bytes)
    except Exception:  # query unavailable -> assume the smallest (v7x) VMEM
        cap = 64 << 20
    return int(min(max(cap * 3 // 4, 32 << 20), 100 << 20))


def _conv_step_vmem_bytes(th, w_pad, cin, cout, cout_p, k_pad, out_itemsize):
    """Complete per-step working-set estimate (buffers double-counted x2)."""
    w_in = w_pad + 2
    in_main = 2 * th * w_in * cin * 2                   # bf16 main tile, 2 bufs
    in_halo = 2 * 2 * w_in * cin * 2                    # two halo rows, 2 bufs
    weights = 2 * (k_pad * cout_p * 2 + cout_p * 4)     # invariant, still 2 bufs
    out = 2 * th * w_pad * cout * out_itemsize          # output tile, 2 bufs
    patch = th * w_pad * k_pad * 2                      # im2col scratch (bf16)
    live = 2 * th * w_pad * cout_p * 4                  # f32 acc + epilogue temp
    return in_main + in_halo + weights + out + patch + live


def _choose_tile_h(H, N, w_pad, cin, cout, cout_p, k_pad, out_itemsize, budget):
    """Largest TH dividing H that fits `budget` and keeps >=4 grid steps."""
    divisors = [d for d in range(min(H, 512), 0, -1) if H % d == 0]
    feasible = [d for d in divisors
                if _conv_step_vmem_bytes(d, w_pad, cin, cout, cout_p, k_pad,
                                         out_itemsize) <= budget]
    if not feasible:
        return 1
    for d in feasible:                 # descending: largest tile first
        if N * (H // d) >= 4:          # keep enough steps for pipeline/megacore
            return d
    return feasible[0]


# --------------------------- Darknet_Convolutional ---------------------------
def darknet_convolutional_nhwc(x_nhwc, w_hwio, bn_scale, bn_bias, *,
                               tile_h=None):
    """3x3 / stride 1 / pad 1 conv + BN(eval) + LeakyReLU(0.1), NHWC layout."""
    N, H, W, Cin = x_nhwc.shape
    kh, kw, wcin, Cout = w_hwio.shape
    assert (kh, kw) == (3, 3) and wcin == Cin
    out_dtype = x_nhwc.dtype
    out_itemsize = jnp.dtype(out_dtype).itemsize

    W_pad = _round_up(W, 8)            # free (TH, W, K)->(TH*W, K) relayout
    cout_p = _round_up(Cout, _LANE)    # lane-dense MXU N dim
    k_real = 9 * Cin
    k_pad = _round_up(k_real, _LANE)   # compact contraction dim

    vmem_limit = _vmem_limit_bytes()
    if tile_h is None:
        tile_h = _choose_tile_h(H, N, W_pad, Cin, Cout, cout_p, k_pad,
                                out_itemsize, vmem_limit - (2 << 20))
    assert H % tile_h == 0, "tile_h must divide H"
    n_h = H // tile_h

    # Fold BN scale into the conv weights; compact-K im2col weight layout.
    w_folded = (w_hwio.astype(jnp.float32)
                * bn_scale.astype(jnp.float32)[None, None, None, :])
    w2d = jnp.pad(w_folded.reshape(k_real, Cout),
                  ((0, k_pad - k_real), (0, cout_p - Cout))
                  ).astype(jnp.bfloat16)
    bias_p = jnp.pad(bn_bias.astype(jnp.float32),
                     (0, cout_p - Cout)).reshape(1, cout_p)

    # 1-pixel halo pad (+ right pad to an 8-aligned width); bf16 MXU operand.
    xp = jnp.pad(x_nhwc.astype(jnp.bfloat16),
                 ((0, 0), (1, 1), (1, 1 + (W_pad - W)), (0, 0)))
    W_in = W_pad + 2

    cost = pl.CostEstimate(
        flops=2 * N * H * W * 9 * Cin * Cout,
        transcendentals=0,
        bytes_accessed=int(N * (H + 2) * W_in * Cin * 2
                           + k_pad * cout_p * 2
                           + N * H * W_pad * Cout * out_itemsize))

    # TODO(synk): invariant weight/bias specs could be single-buffered via
    # pipeline_mode=pl.Buffered(1); their 2x buffer is accounted in the budget
    # instead.  An accumulate-over-taps variant (no im2col scratch) would free
    # more VMEM for Cin >= 256 on v7x.
    out = pl.pallas_call(
        _darknet_conv_kernel,
        out_shape=jax.ShapeDtypeStruct((N, H, W_pad, Cout), out_dtype),
        grid_spec=pltpu.PrefetchScalarGridSpec(
            num_scalar_prefetch=0,
            grid=(N, n_h),
            in_specs=[
                # main tile: padded rows [h*tile_h, h*tile_h + tile_h)
                pl.BlockSpec((1, tile_h, W_in, Cin),
                             lambda n, h: (n, h, 0, 0)),
                # two single halo rows just below the tile (plain Blocked)
                pl.BlockSpec((1, 1, W_in, Cin),
                             lambda n, h: (n, (h + 1) * tile_h, 0, 0)),
                pl.BlockSpec((1, 1, W_in, Cin),
                             lambda n, h: (n, (h + 1) * tile_h + 1, 0, 0)),
                # invariant operands (constant block index -> no re-DMA)
                pl.BlockSpec((k_pad, cout_p), lambda n, h: (0, 0)),
                pl.BlockSpec((1, cout_p), lambda n, h: (0, 0)),
            ],
            out_specs=pl.BlockSpec((1, tile_h, W_pad, Cout),
                                   lambda n, h: (n, h, 0, 0)),
            scratch_shapes=[pltpu.VMEM((tile_h, W_pad, k_pad), jnp.bfloat16)],
        ),
        compiler_params=pltpu.CompilerParams(
            dimension_semantics=("parallel", "parallel"),
            vmem_limit_bytes=int(vmem_limit),
        ),
        cost_estimate=cost,
    )(xp, xp, xp, w2d, bias_p)

    if W_pad != W:
        out = out[:, :, :W, :]
    return out


# ------------------------------ CSP_Block -----------------------------------
def make_csp_params(in_channels, key):
    """Deterministic eval-mode params for transition0 = Darknet_Convolutional."""
    k_w, k_g, k_b, k_m, k_v = jax.random.split(key, 5)
    fan_in = in_channels * 3 * 3
    w_oihw = jax.random.normal(
        k_w, (in_channels, in_channels, 3, 3), dtype=jnp.float32
    ) * (1.0 / np.sqrt(fan_in))
    gamma = 1.0 + 0.1 * jax.random.normal(k_g, (in_channels,), jnp.float32)
    beta = 0.1 * jax.random.normal(k_b, (in_channels,), jnp.float32)
    running_mean = 0.1 * jax.random.normal(k_m, (in_channels,), jnp.float32)
    running_var = jnp.abs(
        1.0 + 0.1 * jax.random.normal(k_v, (in_channels,), jnp.float32))
    eps = 1e-5

    scale = gamma / jnp.sqrt(running_var + eps)
    bias = beta - running_mean * scale
    w_hwio = jnp.transpose(w_oihw, (2, 3, 1, 0))  # OIHW -> HWIO
    return {"w_hwio": w_hwio, "bn_scale": scale, "bn_bias": bias}


def csp_block_forward_nhwc(x_nhwc, params, layer_fn=lambda z: z, tile_h=None):
    """Transpose-free CSP_Block (channels-last end to end)."""
    C = x_nhwc.shape[-1]
    assert C % 2 == 0, "CSP_Block expects an even channel count"
    size = C // 2
    part1 = x_nhwc[..., :size]
    part2 = layer_fn(x_nhwc[..., size:])
    y = darknet_convolutional_nhwc(part2, params["w_hwio"], params["bn_scale"],
                                   params["bn_bias"], tile_h=tile_h)
    return jnp.concatenate([part1, y.astype(x_nhwc.dtype)], axis=-1)


def csp_block_forward(x_nchw, params, layer_fn=lambda z: z, tile_h=None):
    """CSP_Block.forward on NCHW input (PyTorch layout parity)."""
    N, C, H, W = x_nchw.shape
    assert C % 2 == 0, "CSP_Block expects an even channel count"
    size = C // 2
    part1 = x_nchw[:, :size, :, :]
    part2 = layer_fn(x_nchw[:, size:, :, :])  # TODO(synk): injected `layer`; identity here
    assert part2.shape[1] == params["w_hwio"].shape[2], \
        "injected `layer` must preserve the channel count expected by transition0"

    # TODO(synk): NCHW<->NHWC transposes + concat are PyTorch-layout boundary
    # glue; use csp_block_forward_nhwc to run the block transpose-free.
    p2_nhwc = jnp.transpose(part2, (0, 2, 3, 1))
    y_nhwc = darknet_convolutional_nhwc(
        p2_nhwc, params["w_hwio"], params["bn_scale"], params["bn_bias"],
        tile_h=tile_h)
    part2_out = jnp.transpose(y_nhwc, (0, 3, 1, 2)).astype(x_nchw.dtype)
    return jnp.concatenate([part1, part2_out], axis=1)


# --------------------------- reference (plain JAX) ---------------------------
def _reference_forward(x_nchw, params, layer_fn=lambda z: z):
    """Same math, same bf16 operand quantization, via lax.conv."""
    size = x_nchw.shape[1] // 2
    part1 = x_nchw[:, :size]
    part2 = layer_fn(x_nchw[:, size:])

    w_folded = params["w_hwio"] * params["bn_scale"][None, None, None, :]
    w_bf = w_folded.astype(jnp.bfloat16).astype(jnp.float32)
    x_bf = part2.astype(jnp.bfloat16).astype(jnp.float32)
    w_oihw = jnp.transpose(w_bf, (3, 2, 0, 1))
    conv = jax.lax.conv_general_dilated(
        x_bf, w_oihw, window_strides=(1, 1), padding=((1, 1), (1, 1)),
        dimension_numbers=("NCHW", "OIHW", "NCHW"),
        preferred_element_type=jnp.float32,
    )
    y = conv + params["bn_bias"][None, :, None, None]
    y = jnp.where(y > 0, y, 0.1 * y)
    return jnp.concatenate([part1, y], axis=1)


if __name__ == "__main__":
    key = jax.random.PRNGKey(0)
    k_x, k_p = jax.random.split(key)

    N, C, H, W = 2, 8, 16, 16          # full input channels C; split -> C//2 each
    in_channels = C // 2               # matches CSP_Block(layer, in_channels)

    x = jax.random.normal(k_x, (N, C, H, W), dtype=jnp.float32)
    params = make_csp_params(in_channels, k_p)

    # Default tile chooser picks tile_h=8 here -> grid=(2, 2): exercises the
    # multi-tile halo-stitching path even at toy size.
    fwd = jax.jit(lambda xx, pp: csp_block_forward(xx, pp))
    out = jax.block_until_ready(fwd(x, params))
    ref = jax.block_until_ready(_reference_forward(x, params))

    assert out.shape == (N, C, H, W)
    # bf16 matmul operands on both sides -> tight tolerance is valid.
    assert np.allclose(np.asarray(out), np.asarray(ref), atol=5e-3, rtol=5e-3)

    print("KERNEL_OK")
</pallas_src>

<mosaic_0001>
module attributes {stable_mosaic.version = 11 : i64} {
  func.func @_darknet_conv_kernel(%arg0: i32, %arg1: i32, %arg2: memref<1x8x18x4xbf16, #tpu.memory_space<vmem>>, %arg3: memref<1x1x18x4xbf16, #tpu.memory_space<vmem>>, %arg4: memref<1x1x18x4xbf16, #tpu.memory_space<vmem>>, %arg5: memref<128x128xbf16, #tpu.memory_space<vmem>>, %arg6: memref<1x128xf32, #tpu.memory_space<vmem>>, %arg7: memref<1x8x16x4xf32, #tpu.memory_space<vmem>>, %arg8: memref<8x16x128xbf16, #tpu.memory_space<vmem>>) attributes {dimension_semantics = [#tpu.dimension_semantics<parallel>, #tpu.dimension_semantics<parallel>], iteration_bounds = array<i64: 2, 2>, scalar_prefetch = 0 : i64, scratch_operands = 1 : i64, tpu.core_type = #tpu.core_type<tc>, window_params = [{transform_indices = @transform_0, window_bounds = array<i64: 1, 8, 18, 4>}, {transform_indices = @transform_1, window_bounds = array<i64: 1, 1, 18, 4>}, {transform_indices = @transform_2, window_bounds = array<i64: 1, 1, 18, 4>}, {pipeline_mode = #tpu.pipeline_mode<synchronous>, transform_indices = @transform_3, window_bounds = array<i64: 128, 128>}, {pipeline_mode = #tpu.pipeline_mode<synchronous>, transform_indices = @transform_4, window_bounds = array<i64: 1, 128>}, {transform_indices = @transform_5, window_bounds = array<i64: 1, 8, 16, 4>}]} {
    %c0 = arith.constant 0 : index
    %c0_0 = arith.constant 0 : index
    %c0_1 = arith.constant 0 : index
    %c0_2 = arith.constant 0 : index
    %0 = vector.load %arg2[%c0, %c0_0, %c0_1, %c0_2] : memref<1x8x18x4xbf16, #tpu.memory_space<vmem>>, vector<1x8x16x4xbf16>
    %1 = vector.shape_cast %0 : vector<1x8x16x4xbf16> to vector<8x16x4xbf16>
    %c0_3 = arith.constant 0 : index
    %c0_4 = arith.constant 0 : index
    %c0_5 = arith.constant 0 : index
    %2 = vector.load %arg8[%c0_3, %c0_4, %c0_5] : memref<8x16x128xbf16, #tpu.memory_space<vmem>>, vector<8x16x4xbf16>
    tpu.vector_store %arg8[%c0_3, %c0_4, %c0_5], %1 {strides = array<i32>} : memref<8x16x128xbf16, #tpu.memory_space<vmem>>, vector<8x16x4xbf16>,
    %c0_6 = arith.constant 0 : index
    %c0_7 = arith.constant 0 : index
    %c1 = arith.constant 1 : index
    %c0_8 = arith.constant 0 : index
    %3 = vector.load %arg2[%c0_6, %c0_7, %c1, %c0_8] : memref<1x8x18x4xbf16, #tpu.memory_space<vmem>>, vector<1x8x16x4xbf16>
    %4 = vector.shape_cast %3 : vector<1x8x16x4xbf16> to vector<8x16x4xbf16>
    %c0_9 = arith.constant 0 : index
    %c0_10 = arith.constant 0 : index
    %c4 = arith.constant 4 : index
    %5 = vector.load %arg8[%c0_9, %c0_10, %c4] : memref<8x16x128xbf16, #tpu.memory_space<vmem>>, vector<8x16x4xbf16>
    tpu.vector_store %arg8[%c0_9, %c0_10, %c4], %4 {strides = array<i32>} : memref<8x16x128xbf16, #tpu.memory_space<vmem>>, vector<8x16x4xbf16>,
    %c0_11 = arith.constant 0 : index
    %c0_12 = arith.constant 0 : index
    %c2 = arith.constant 2 : index
    %c0_13 = arith.constant 0 : index
    %6 = vector.load %arg2[%c0_11, %c0_12, %c2, %c0_13] : memref<1x8x18x4xbf16, #tpu.memory_space<vmem>>, vector<1x8x16x4xbf16>
    %7 = vector.shape_cast %6 : vector<1x8x16x4xbf16> to vector<8x16x4xbf16>
    %c0_14 = arith.constant 0 : index
    %c0_15 = arith.constant 0 : index
    %c8 = arith.constant 8 : index
    %8 = vector.load %arg8[%c0_14, %c0_15, %c8] : memref<8x16x128xbf16, #tpu.memory_space<vmem>>, vector<8x16x4xbf16>
    tpu.vector_store %arg8[%c0_14, %c0_15, %c8], %7 {strides = array<i32>} : memref<8x16x128xbf16, #tpu.memory_space<vmem>>, vector<8x16x4xbf16>,
    %c0_16 = arith.constant 0 : index
    %c1_17 = arith.constant 1 : index
    %c0_18 = arith.constant 0 : index
    %c0_19 = arith.constant 0 : index
    %9 = vector.load %arg2[%c0_16, %c1_17, %c0_18, %c0_19] : memref<1x8x18x4xbf16, #tpu.memory_space<vmem>>, vector<1x7x16x4xbf16>
    %10 = vector.shape_cast %9 : vector<1x7x16x4xbf16> to vector<7x16x4xbf16>
    %c0_20 = arith.constant 0 : index
    %c0_21 = arith.constant 0 : index
    %c12 = arith.constant 12 : index
    %11 = vector.load %arg8[%c0_20, %c0_21, %c12] : memref<8x16x128xbf16, #tpu.memory_space<vmem>>, vector<7x16x4xbf16>
    tpu.vector_store %arg8[%c0_20, %c0_21, %c12], %10 {strides = array<i32>} : memref<8x16x128xbf16, #tpu.memory_space<vmem>>, vector<7x16x4xbf16>,
    %c0_22 = arith.constant 0 : index
    %c0_23 = arith.constant 0 : index
    %c0_24 = arith.constant 0 : index
    %c0_25 = arith.constant 0 : index
    %12 = vector.load %arg3[%c0_22, %c0_23, %c0_24, %c0_25] : memref<1x1x18x4xbf16, #tpu.memory_space<vmem>>, vector<1x1x16x4xbf16>
    %13 = vector.shape_cast %12 : vector<1x1x16x4xbf16> to vector<1x16x4xbf16>
    %c7 = arith.constant 7 : index
    %c0_26 = arith.constant 0 : index
    %c12_27 = arith.constant 12 : index
    %14 = vector.load %arg8[%c7, %c0_26, %c12_27] : memref<8x16x128xbf16, #tpu.memory_space<vmem>>, vector<1x16x4xbf16>
    tpu.vector_store %arg8[%c7, %c0_26, %c12_27], %13 {strides = array<i32>} : memref<8x16x128xbf16, #tpu.memory_space<vmem>>, vector<1x16x4xbf16>,
    %c0_28 = arith.constant 0 : index
    %c1_29 = arith.constant 1 : index
    %c1_30 = arith.constant 1 : index
    %c0_31 = arith.constant 0 : index
    %15 = vector.load %arg2[%c0_28, %c1_29, %c1_30, %c0_31] : memref<1x8x18x4xbf16, #tpu.memory_space<vmem>>, vector<1x7x16x4xbf16>
    %16 = vector.shape_cast %15 : vector<1x7x16x4xbf16> to vector<7x16x4xbf16>
    %c0_32 = arith.constant 0 : index
    %c0_33 = arith.constant 0 : index
    %c16 = arith.constant 16 : index
    %17 = vector.load %arg8[%c0_32, %c0_33, %c16] : memref<8x16x128xbf16, #tpu.memory_space<vmem>>, vector<7x16x4xbf16>
    tpu.vector_store %arg8[%c0_32, %c0_33, %c16], %16 {strides = array<i32>} : memref<8x16x128xbf16, #tpu.memory_space<vmem>>, vector<7x16x4xbf16>,
    %c0_34 = arith.constant 0 : index
    %c0_35 = arith.constant 0 : index
    %c1_36 = arith.constant 1 : index
    %c0_37 = arith.constant 0 : index
    %18 = vector.load %arg3[%c0_34, %c0_35, %c1_36, %c0_37] : memref<1x1x18x4xbf16, #tpu.memory_space<vmem>>, vector<1x1x16x4xbf16>
    %19 = vector.shape_cast %18 : vector<1x1x16x4xbf16> to vector<1x16x4xbf16>
    %c7_38 = arith.constant 7 : index
    %c0_39 = arith.constant 0 : index
    %c16_40 = arith.constant 16 : index
    %20 = vector.load %arg8[%c7_38, %c0_39, %c16_40] : memref<8x16x128xbf16, #tpu.memory_space<vmem>>, vector<1x16x4xbf16>
    tpu.vector_store %arg8[%c7_38, %c0_39, %c16_40], %19 {strides = array<i32>} : memref<8x16x128xbf16, #tpu.memory_space<vmem>>, vector<1x16x4xbf16>,
    %c0_41 = arith.constant 0 : index
    %c1_42 = arith.constant 1 : index
    %c2_43 = arith.constant 2 : index
    %c0_44 = arith.constant 0 : index
    %21 = vector.load %arg2[%c0_41, %c1_42, %c2_43, %c0_44] : memref<1x8x18x4xbf16, #tpu.memory_space<vmem>>, vector<1x7x16x4xbf16>
    %22 = vector.shape_cast %21 : vector<1x7x16x4xbf16> to vector<7x16x4xbf16>
    %c0_45 = arith.constant 0 : index
    %c0_46 = arith.constant 0 : index
    %c20 = arith.constant 20 : index
    %23 = vector.load %arg8[%c0_45, %c0_46, %c20] : memref<8x16x128xbf16, #tpu.memory_space<vmem>>, vector<7x16x4xbf16>
    tpu.vector_store %arg8[%c0_45, %c0_46, %c20], %22 {strides = array<i32>} : memref<8x16x128xbf16, #tpu.memory_space<vmem>>, vector<7x16x4xbf16>,
    %c0_47 = arith.constant 0 : index
    %c0_48 = arith.constant 0 : index
    %c2_49 = arith.constant 2 : index
    %c0_50 = arith.constant 0 : index
    %24 = vector.load %arg3[%c0_47, %c0_48, %c2_49, %c0_50] : memref<1x1x18x4xbf16, #tpu.memory_space<vmem>>, vector<1x1x16x4xbf16>
    %25 = vector.shape_cast %24 : vector<1x1x16x4xbf16> to vector<1x16x4xbf16>
    %c7_51 = arith.constant 7 : index
    %c0_52 = arith.constant 0 : index
    %c20_53 = arith.constant 20 : index
    %26 = vector.load %arg8[%c7_51, %c0_52, %c20_53] : memref<8x16x128xbf16, #tpu.memory_space<vmem>>, vector<1x16x4xbf16>
    tpu.vector_store %arg8[%c7_51, %c0_52, %c20_53], %25 {strides = array<i32>} : memref<8x16x128xbf16, #tpu.memory_space<vmem>>, vector<1x16x4xbf16>,
    %c0_54 = arith.constant 0 : index
    %c2_55 = arith.constant 2 : index
    %c0_56 = arith.constant 0 : index
    %c0_57 = arith.constant 0 : index
    %27 = vector.load %arg2[%c0_54, %c2_55, %c0_56, %c0_57] : memref<1x8x18x4xbf16, #tpu.memory_space<vmem>>, vector<1x6x16x4xbf16>
    %28 = vector.shape_cast %27 : vector<1x6x16x4xbf16> to vector<6x16x4xbf16>
    %c0_58 = arith.constant 0 : index
    %c0_59 = arith.constant 0 : index
    %c24 = arith.constant 24 : index
    %29 = vector.load %arg8[%c0_58, %c0_59, %c24] : memref<8x16x128xbf16, #tpu.memory_space<vmem>>, vector<6x16x4xbf16>
    tpu.vector_store %arg8[%c0_58, %c0_59, %c24], %28 {strides = array<i32>} : memref<8x16x128xbf16, #tpu.memory_space<vmem>>, vector<6x16x4xbf16>,
    %c0_60 = arith.constant 0 : index
    %c0_61 = arith.constant 0 : index
    %c0_62 = arith.constant 0 : index
    %c0_63 = arith.constant 0 : index
    %30 = vector.load %arg3[%c0_60, %c0_61, %c0_62, %c0_63] : memref<1x1x18x4xbf16, #tpu.memory_space<vmem>>, vector<1x1x16x4xbf16>
    %31 = vector.shape_cast %30 : vector<1x1x16x4xbf16> to vector<1x16x4xbf16>
    %c6 = arith.constant 6 : index
    %c0_64 = arith.constant 0 : index
    %c24_65 = arith.constant 24 : index
    %32 = vector.load %arg8[%c6, %c0_64, %c24_65] : memref<8x16x128xbf16, #tpu.memory_space<vmem>>, vector<1x16x4xbf16>
    tpu.vector_store %arg8[%c6, %c0_64, %c24_65], %31 {strides = array<i32>} : memref<8x16x128xbf16, #tpu.memory_space<vmem>>, vector<1x16x4xbf16>,
    %c0_66 = arith.constant 0 : index
    %c0_67 = arith.constant 0 : index
    %c0_68 = arith.constant 0 : index
    %c0_69 = arith.constant 0 : index
    %33 = vector.load %arg4[%c0_66, %c0_67, %c0_68, %c0_69] : memref<1x1x18x4xbf16, #tpu.memory_space<vmem>>, vector<1x1x16x4xbf16>
    %34 = vector.shape_cast %33 : vector<1x1x16x4xbf16> to vector<1x16x4xbf16>
    %c7_70 = arith.constant 7 : index
    %c0_71 = arith.constant 0 : index
    %c24_72 = arith.constant 24 : index
    %35 = vector.load %arg8[%c7_70, %c0_71, %c24_72] : memref<8x16x128xbf16, #tpu.memory_space<vmem>>, vector<1x16x4xbf16>
    tpu.vector_store %arg8[%c7_70, %c0_71, %c24_72], %34 {strides = array<i32>} : memref<8x16x128xbf16, #tpu.memory_space<vmem>>, vector<1x16x4xbf16>,
    %c0_73 = arith.constant 0 : index
    %c2_74 = arith.constant 2 : index
    %c1_75 = arith.constant 1 : index
    %c0_76 = arith.constant 0 : index
    %36 = vector.load %arg2[%c0_73, %c2_74, %c1_75, %c0_76] : memref<1x8x18x4xbf16, #tpu.memory_space<vmem>>, vector<1x6x16x4xbf16>
    %37 = vector.shape_cast %36 : vector<1x6x16x4xbf16> to vector<6x16x4xbf16>
    %c0_77 = arith.constant 0 : index
    %c0_78 = arith.constant 0 : index
    %c28 = arith.constant 28 : index
    %38 = vector.load %arg8[%c0_77, %c0_78, %c28] : memref<8x16x128xbf16, #tpu.memory_space<vmem>>, vector<6x16x4xbf16>
    tpu.vector_store %arg8[%c0_77, %c0_78, %c28], %37 {strides = array<i32>} : memref<8x16x128xbf16, #tpu.memory_space<vmem>>, vector<6x16x4xbf16>,
    %c0_79 = arith.constant 0 : index
    %c0_80 = arith.constant 0 : index
    %c1_81 = arith.constant 1 : index
    %c0_82 = arith.constant 0 : index
    %39 = vector.load %arg3[%c0_79, %c0_80, %c1_81, %c0_82] : memref<1x1x18x4xbf16, #tpu.memory_space<vmem>>, vector<1x1x16x4xbf16>
    %40 = vector.shape_cast %39 : vector<1x1x16x4xbf16> to vector<1x16x4xbf16>
    %c6_83 = arith.constant 6 : index
    %c0_84 = arith.constant 0 : index
    %c28_85 = arith.constant 28 : index
    %41 = vector.load %arg8[%c6_83, %c0_84, %c28_85] : memref<8x16x128xbf16, #tpu.memory_space<vmem>>, vector<1x16x4xbf16>
    tpu.vector_store %arg8[%c6_83, %c0_84, %c28_85], %40 {strides = array<i32>} : memref<8x16x128xbf16, #tpu.memory_space<vmem>>, vector<1x16x4xbf16>,
    %c0_86 = arith.constant 0 : index
    %c0_87 = arith.constant 0 : index
    %c1_88 = arith.constant 1 : index
    %c0_89 = arith.constant 0 : index
    %42 = vector.load %arg4[%c0_86, %c0_87, %c1_88, %c0_89] : memref<1x1x18x4xbf16, #tpu.memory_space<vmem>>, vector<1x1x16x4xbf16>
    %43 = vector.shape_cast %42 : vector<1x1x16x4xbf16> to vector<1x16x4xbf16>
    %c7_90 = arith.constant 7 : index
    %c0_91 = arith.constant 0 : index
    %c28_92 = arith.constant 28 : index
    %44 = vector.load %arg8[%c7_90, %c0_91, %c28_92] : memref<8x16x128xbf16, #tpu.memory_space<vmem>>, vector<1x16x4xbf16>
    tpu.vector_store %arg8[%c7_90, %c0_91, %c28_92], %43 {strides = array<i32>} : memref<8x16x128xbf16, #tpu.memory_space<vmem>>, vector<1x16x4xbf16>,
    %c0_93 = arith.constant 0 : index
    %c2_94 = arith.constant 2 : index
    %c2_95 = arith.constant 2 : index
    %c0_96 = arith.constant 0 : index
    %45 = vector.load %arg2[%c0_93, %c2_94, %c2_95, %c0_96] : memref<1x8x18x4xbf16, #tpu.memory_space<vmem>>, vector<1x6x16x4xbf16>
    %46 = vector.shape_cast %45 : vector<1x6x16x4xbf16> to vector<6x16x4xbf16>
    %c0_97 = arith.constant 0 : index
    %c0_98 = arith.constant 0 : index
    %c32 = arith.constant 32 : index
    %47 = vector.load %arg8[%c0_97, %c0_98, %c32] : memref<8x16x128xbf16, #tpu.memory_space<vmem>>, vector<6x16x4xbf16>
    tpu.vector_store %arg8[%c0_97, %c0_98, %c32], %46 {strides = array<i32>} : memref<8x16x128xbf16, #tpu.memory_space<vmem>>, vector<6x16x4xbf16>,
    %c0_99 = arith.constant 0 : index
    %c0_100 = arith.constant 0 : index
    %c2_101 = arith.constant 2 : index
    %c0_102 = arith.constant 0 : index
    %48 = vector.load %arg3[%c0_99, %c0_100, %c2_101, %c0_102] : memref<1x1x18x4xbf16, #tpu.memory_space<vmem>>, vector<1x1x16x4xbf16>
    %49 = vector.shape_cast %48 : vector<1x1x16x4xbf16> to vector<1x16x4xbf16>
    %c6_103 = arith.constant 6 : index
    %c0_104 = arith.constant 0 : index
    %c32_105 = arith.constant 32 : index
    %50 = vector.load %arg8[%c6_103, %c0_104, %c32_105] : memref<8x16x128xbf16, #tpu.memory_space<vmem>>, vector<1x16x4xbf16>
    tpu.vector_store %arg8[%c6_103, %c0_104, %c32_105], %49 {strides = array<i32>} : memref<8x16x128xbf16, #tpu.memory_space<vmem>>, vector<1x16x4xbf16>,
    %c0_106 = arith.constant 0 : index
    %c0_107 = arith.constant 0 : index
    %c2_108 = arith.constant 2 : index
    %c0_109 = arith.constant 0 : index
    %51 = vector.load %arg4[%c0_106, %c0_107, %c2_108, %c0_109] : memref<1x1x18x4xbf16, #tpu.memory_space<vmem>>, vector<1x1x16x4xbf16>
    %52 = vector.shape_cast %51 : vector<1x1x16x4xbf16> to vector<1x16x4xbf16>
    %c7_110 = arith.constant 7 : index
    %c0_111 = arith.constant 0 : index
    %c32_112 = arith.constant 32 : index
    %53 = vector.load %arg8[%c7_110, %c0_111, %c32_112] : memref<8x16x128xbf16, #tpu.memory_space<vmem>>, vector<1x16x4xbf16>
    tpu.vector_store %arg8[%c7_110, %c0_111, %c32_112], %52 {strides = array<i32>} : memref<8x16x128xbf16, #tpu.memory_space<vmem>>, vector<1x16x4xbf16>,
    %cst = arith.constant 0.000000e+00 : bf16
    %54 = vector.broadcast %cst : bf16 to vector<8x16x92xbf16>
    %c0_113 = arith.constant 0 : index
    %c0_114 = arith.constant 0 : index
    %c36 = arith.constant 36 : index
    %55 = vector.load %arg8[%c0_113, %c0_114, %c36] : memref<8x16x128xbf16, #tpu.memory_space<vmem>>, vector<8x16x92xbf16>
    tpu.vector_store %arg8[%c0_113, %c0_114, %c36], %54 {strides = array<i32>} : memref<8x16x128xbf16, #tpu.memory_space<vmem>>, vector<8x16x92xbf16>,
    %c0_115 = arith.constant 0 : index
    %c0_116 = arith.constant 0 : index
    %c0_117 = arith.constant 0 : index
    %56 = vector.load %arg8[%c0_115, %c0_116, %c0_117] : memref<8x16x128xbf16, #tpu.memory_space<vmem>>, vector<8x16x128xbf16>
    %57 = vector.shape_cast %56 : vector<8x16x128xbf16> to vector<128x128xbf16>
    %c0_118 = arith.constant 0 : index
    %c0_119 = arith.constant 0 : index
    %58 = vector.load %arg5[%c0_118, %c0_119] : memref<128x128xbf16, #tpu.memory_space<vmem>>, vector<128x128xbf16>
    %cst_120 = arith.constant dense<0.000000e+00> : vector<128x128xf32>
    %59 = tpu.matmul %57, %58, %cst_120 {dimension_numbers = #tpu.dot_dimension_numbers<[1], [0], [0], [1], [0, 0, 1, 1], [], []>} : vector<128x128xbf16>, vector<128x128xbf16>, vector<128x128xf32> -> vector<128x128xf32>
    %c0_121 = arith.constant 0 : index
    %c0_122 = arith.constant 0 : index
    %60 = vector.load %arg6[%c0_121, %c0_122] : memref<1x128xf32, #tpu.memory_space<vmem>>, vector<1x128xf32>
    %61 = vector.shape_cast %60 : vector<1x128xf32> to vector<128xf32>
    %62 = vector.shape_cast %61 : vector<128xf32> to vector<1x128xf32>
    %63 = vector.broadcast %62 : vector<1x128xf32> to vector<128x128xf32>
    %64 = arith.addf %59, %63 : vector<128x128xf32>
    %cst_123 = arith.constant 0.000000e+00 : f32
    %65 = vector.broadcast %cst_123 : f32 to vector<128x128xf32>
    %66 = arith.cmpf ogt, %64, %65 : vector<128x128xf32>
    %cst_124 = arith.constant 1.000000e-01 : f32
    %67 = vector.broadcast %cst_124 : f32 to vector<128x128xf32>
    %68 = arith.mulf %67, %64 : vector<128x128xf32>
    %69 = arith.select %66, %64, %68 : vector<128x128xi1>, vector<128x128xf32>
    %70 = vector.shape_cast %69 : vector<128x128xf32> to vector<1x8x16x128xf32>
    %71 = vector.extract_strided_slice %70 {offsets = [0, 0, 0, 0], sizes = [1, 8, 16, 4], strides = [1, 1, 1, 1]} : vector<1x8x16x128xf32> to vector<1x8x16x4xf32>
    %c0_125 = arith.constant 0 : index
    %c0_126 = arith.constant 0 : index
    %c0_127 = arith.constant 0 : index
    %c0_128 = arith.constant 0 : index
    %72 = vector.load %arg7[%c0_125, %c0_126, %c0_127, %c0_128] : memref<1x8x16x4xf32, #tpu.memory_space<vmem>>, vector<1x8x16x4xf32>
    tpu.vector_store %arg7[%c0_125, %c0_126, %c0_127, %c0_128], %71 {strides = array<i32>} : memref<1x8x16x4xf32, #tpu.memory_space<vmem>>, vector<1x8x16x4xf32>,
    return
  }
  func.func @transform_0(%arg0: i32, %arg1: i32) -> (i32, i32, i32, i32) {
    %c0_i32 = arith.constant 0 : i32
    %c0_i32_0 = arith.constant 0 : i32
    %c0_i32_1 = arith.constant 0 : i32
    return %arg0, %arg1, %c0_i32, %c0_i32_0 : i32, i32, i32, i32
  }
  func.func @transform_1(%arg0: i32, %arg1: i32) -> (i32, i32, i32, i32) {
    %c1_i32 = arith.constant 1 : i32
    %0 = arith.addi %arg1, %c1_i32 : i32
    %c8_i32 = arith.constant 8 : i32
    %1 = arith.muli %0, %c8_i32 : i32
    %c0_i32 = arith.constant 0 : i32
    %c0_i32_0 = arith.constant 0 : i32
    %c0_i32_1 = arith.constant 0 : i32
    return %arg0, %1, %c0_i32, %c0_i32_0 : i32, i32, i32, i32
  }
  func.func @transform_2(%arg0: i32, %arg1: i32) -> (i32, i32, i32, i32) {
    %c1_i32 = arith.constant 1 : i32
    %0 = arith.addi %arg1, %c1_i32 : i32
    %c8_i32 = arith.constant 8 : i32
    %1 = arith.muli %0, %c8_i32 : i32
    %c1_i32_0 = arith.constant 1 : i32
    %2 = arith.addi %1, %c1_i32_0 : i32
    %c0_i32 = arith.constant 0 : i32
    %c0_i32_1 = arith.constant 0 : i32
    %c0_i32_2 = arith.constant 0 : i32
    return %arg0, %2, %c0_i32, %c0_i32_1 : i32, i32, i32, i32
  }
  func.func @transform_3(%arg0: i32, %arg1: i32) -> (i32, i32) {
    %c0_i32 = arith.constant 0 : i32
    %c0_i32_0 = arith.constant 0 : i32
    %c0_i32_1 = arith.constant 0 : i32
    return %c0_i32, %c0_i32_0 : i32, i32
  }
  func.func @transform_4(%arg0: i32, %arg1: i32) -> (i32, i32) {
    %c0_i32 = arith.constant 0 : i32
    %c0_i32_0 = arith.constant 0 : i32
    %c0_i32_1 = arith.constant 0 : i32
    return %c0_i32, %c0_i32_0 : i32, i32
  }
  func.func @transform_5(%arg0: i32, %arg1: i32) -> (i32, i32, i32, i32) {
    %c0_i32 = arith.constant 0 : i32
    %c0_i32_0 = arith.constant 0 : i32
    %c0_i32_1 = arith.constant 0 : i32
    return %arg0, %arg1, %c0_i32, %c0_i32_0 : i32, i32, i32, i32
  }
}

</mosaic_0001>

<bundles_post_ra>
// kernel: _lambda_.1
= control target key start
LH: loop header
LB: loop body
LE: loop exit
PB: predicated region body
PF: predicated region fallthrough
CT: control target
= control target key end

     0   :  { %s2787_s18 = smov 0   ;;  %s2789_s19 = smov 0   ;;  %s3668_s0 = inlined_call_operand.vmem [shape: bf16[2,18,18,4], index: 0, kind: input, shape index: {}, may-alias: {0,1,2}]   ;;  %s3669_s1 = inlined_call_operand.vmem [shape: bf16[2,18,18,4], index: 1, kind: input, shape index: {}, may-alias: {0,1,2}]   ;;  %s3670_s2 = inlined_call_operand.vmem [shape: bf16[2,18,18,4], index: 2, kind: input, shape index: {}, may-alias: {0,1,2}]   ;;  %s3671_s3 = inlined_call_operand.vmem [shape: bf16[128,128], index: 3, kind: input, shape index: {}]   ;;  %s3672_s4 = inlined_call_operand.vmem [shape: f32[1,128], index: 4, kind: input, shape index: {}]   ;;  %s3673_s5 = inlined_call_operand.vmem [shape: f32[2,16,16,4], index: 5, kind: output, shape index: {}]  }
   0x1   :  { %s2791_s20 = smov 0   ;;  %s2793_s21 = smov 0  }
   0x2   :  { %s2795_s22 = smov 0  }
   0x3 LB: > { %s24_s23 = sadd.s32 1, %s2738_s20  ;;  %s27_s24 = sadd.s32 1, %s2742_s21  ;;  %s2746_s22 = sphi %s2795_s22, %s15_s22   ;;  %s2742_s21 = sphi %s2793_s21, %s3681_s21   ;;  %s2738_s20 = sphi %s2791_s20, %s3680_s20   ;;  %s2734_s19 = sphi %s2789_s19, %s3679_s19   ;;  %s2730_s18 = sphi %s2787_s18, %s3678_s18  }
   0x4   : > { %p25_p0 = scmp.ge.s32.totalorder %s24_s23, 2  ;;  %p2397_p1 = scmp.ge.s32.totalorder %s2746_s22, 1 }
   0x5   : > { %p271_p2 = scmp.lt.s32.totalorder %s2746_s22, 5 }
   0x6   : > { %s3683_s23 = smov (%p25_p0, %s24_s23), 0  ;;  %s3685_s24 = smov (!%p25_p0, %s27_s24), %s2742_s21 }
   0x7   : > { %p272_p3 = pnand %p2397_p1, %p271_p2  ;;  %p29_p4 = scmp.ge.s32.totalorder %s3685_s24, 2 }
   0x8   : > { %s2817_s25 = sshll.u32 (!%p272_p3), %s2730_s18, 3  ;;  %p343_p5 = scmp.lt.s32.totalorder (!%p272_p3), %s2734_s19, 1 }
   0x9   : > { %s3687_s24 = smov (%p29_p4, %s3685_s24), 0  ;;  %275 = sbr.rel (%p272_p3) target bundleno = 634 (0x27a), region = 40 }
   0xa   : > { %p345_p6 = scmp.lt.s32.totalorder (!%p272_p3), %s2817_s25, 17  ;;  %s2748_s9 = smov (!%p272_p3), 4  }
   0xb   : > { %s2749_s10 = smov (!%p272_p3), 8   ;;  %s2750_s11 = smov (!%p272_p3), 12  }
   0xc   : > { %s3010_s12 = sadd.s32 (!%p272_p3), 8, %s2817_s25  ;;  %s2754_s6 = smov (!%p272_p3), 28  }
   0xd   : > { %p362_p7 = scmp.lt.s32.totalorder (!%p272_p3), %s3010_s12, 17  ;;  %s2755_s7 = smov (!%p272_p3), 32  }
   0xe   : > { %s3689_s19 = smov (!%p343_p5, %s2734_s19), 1  ;;  %vm455_vm0 = vsmask.f32 3328  ;;  %vm456_vm1 = vsmask.f32 7440  ;;  %vm763_vm3 = vcmask 1042432  }
   0xf   : > { %s346_s26 = scalar_select %p345_p6, %s2817_s25, 17  ;;  %vm2841_vm2 = vmor %vm455_vm0, %vm456_vm1  ;;  %vm764_vm4 = vcmask 1046532   ;;  %vm414_vm6 = vcmask 27648   ;;  %vm698_vm7 = vcmask 60448   ;;  %vm870_vm8 = vcmask 93248  }
  0x10   : > { %s2824_s27 = smul.u32 54, %s3689_s19  ;;  %vm2909_vm5 = vmor %vm763_vm3, %vm764_vm4  ;;  %vm958_vm9 = vcmask 126048   ;;  %vm1217_vm10 = vcmask 158848   ;;  %vm1400_vm11 = vcmask 191648   ;;  %vm1497_vm12 = vcmask 224448   ;;  %p389_p9 = scmp.lt.s32.totalorder %s2817_s25, 15 }
  0x11   : > { %s2654_s28 = smul.u32 3, %s346_s26  ;;  %vm1733_vm13 = vcmask 257248   ;;  %vm1985_vm14 = vcmask 1043744   ;;  %vm1930_vm15 = vcmask 290048   ;;  %vm2231_vm0 = vcmask 31744  }
  0x12   : > { %s363_s13 = scalar_select %p362_p7, %s3010_s12, 17 }
  0x13   : > { %s349_s29 = sadd.s32 %s2824_s27, %s2654_s28  ;;  %s2751_s28 = smov 16  }
  0x14   : > { %s2399_s30 = sshll.u32 %s349_s29, 2  ;;  %s2656_s14 = smul.u32 3, %s363_s13 }
  0x15   : > { %s2830_s8 = scalar_lea.vmem %s3668_s0, %s2399_s30  ;;  %s2752_s29 = smov 20  }
  0x16   : > { %v434_v0 = vld [vmem:[%s2830_s8 + $0xc] sm:$0xf]  ;;  %v435_v1 = vld [vmem:[%s2830_s8 + $0x10] sm:$0xf]  ;;  %v431_v2 = vld [vmem:[%s2830_s8] sm:$0xf]  ;;  %s366_s15 = sadd.s32 %s2656_s14, %s2824_s27 }
  0x17   : > { %v483_v3 = vshrl.u32 %v434_v0, 16  ;;  %v486_v4 = vshll.u32 %v434_v0, 16  ;;  %v492_v5 = vshll.u32 %v435_v1, 16  ;;  %v496_v6 = vshrl.u32 %v435_v1, 16  ;;  %v432_v7 = vld [vmem:[%s2830_s8 + $0x4] sm:$0xf] }
  0x18   : > { %v459_v8 = vshrl.u32 %v431_v2, 16  ;;  %v462_v9 = vshll.u32 %v431_v2, 16  ;;  %v468_v10 = vshll.u32 %v432_v7, 16  ;;  %v472_v11 = vshrl.u32 %v432_v7, 16  ;;  %v436_v12 = vld [vmem:[%s2830_s8 + $0x14] sm:$0x1] }
  0x19   : > { %v485_v13 = vrot.slane %v483_v3, 4  ;;  %v488_v14 = vrot.slane %v486_v4, 5  ;;  %v494_v15 = vrot.slane %v492_v5, 5  ;;  %v498_v16 = vrot.slane %v496_v6, 4  ;;  %v433_v17 = vld [vmem:[%s2830_s8 + $0x8] sm:$0x1] }
  0x1a   : > { %v461_v18 = vrot.slane %v459_v8, 4  ;;  %v464_v19 = vrot.slane %v462_v9, 5  ;;  %v474_v20 = vrot.slane %v472_v11, 4  ;;  %v441_v21 = vld [vmem:[%s2830_s8 + $0x28] sm:$0xf]  ;;  %v470_v23 = vrot.slane %v468_v10, 5 }
  0x1b   : > { %v489_v22 = vor.u32 %v488_v14, %v485_v13  ;;  %v499_v24 = vor.u32 %v498_v16, %v494_v15  ;;  %v502_v27 = vshll.u32 %v436_v12, 16  ;;  %v540_v28 = vshll.u32 %v441_v21, 16  ;;  %v440_v30 = vld [vmem:[%s2830_s8 + $0x24] sm:$0xf]  ;;  %v437_v35 = vld [vmem:[%s2830_s8 + $0x18] sm:$0xf] }
  0x1c   : > { %v465_v26 = vor.u32 %v464_v19, %v461_v18  ;;  %v544_v29 = vshrl.u32 %v441_v21, 16  ;;  %v475_v32 = vor.u32 %v474_v20, %v470_v23  ;;  %v478_v33 = vshll.u32 %v433_v17, 16  ;;  %v438_v40 = vld [vmem:[%s2830_s8 + $0x1c] sm:$0xf]  ;;  %v442_v44 = vld [vmem:[%s2830_s8 + $0x2c] sm:$0x1] }
  0x1d   : > { %v490_v31 = vrot.slane %v489_v22, 4  ;;  %v2849_v37 = vrot.slane %v540_v28, 5  ;;  %v531_v39 = vshrl.u32 %v440_v30, 16  ;;  %v500_v42 = vrot.slane %v499_v24, 4  ;;  %v446_v50 = vld [vmem:[%s2830_s8 + $0x3c] sm:$0xf] }
  0x1e   : > { %v466_v34 = vrot.slane %v465_v26, 4  ;;  %v546_v38 = vrot.slane %v544_v29, 4  ;;  %v504_v43 = vrot.slane %v502_v27, 5  ;;  %v534_v45 = vshll.u32 %v440_v30, 16  ;;  %v444_v59 = vld [vmem:[%s2830_s8 + $0x34] sm:$0xf] }
  0x1f   : > { %v495_v36 = vsel %vm2841_vm2, %v490_v31, %v494_v15  ;;  %v476_v46 = vrot.slane %v475_v32, 4  ;;  %v480_v47 = vrot.slane %v478_v33, 5  ;;  %v507_v48 = vshrl.u32 %v437_v35, 16  ;;  %v439_v6 = vld [vmem:[%s2830_s8 + $0x20] sm:$0x1]  ;;  %s2401_s16 = sshll.u32 %s366_s15, 2 }
  0x20   : > { %654 = vrot.lane.b32.xlu1 %v495_v36, %s2748_s9  ;;  %v471_v41 = vsel %vm2841_vm2, %v466_v34, %v470_v23  ;;  %v510_v49 = vshll.u32 %v437_v35, 16  ;;  %v533_v51 = vrot.slane %v531_v39, 4  ;;  %v536_v52 = vrot.slane %v534_v45, 5  ;;  %v447_v10 = vld [vmem:[%s2830_s8 + $0x40] sm:$0xf]  ;;  %s3055_s26 = scalar_lea.vmem %s3669_s1, %s2401_s16  ;;  %s2753_s30 = smov 24  }
  0x21   : > { %650 = vrot.lane.b32.xlu0 %v471_v41, %s2748_s9  ;;  %v516_v53 = vshll.u32 %v438_v40, 16  ;;  %v520_v54 = vshrl.u32 %v438_v40, 16  ;;  %v547_v55 = vor.u32 %v546_v38, %v2849_v37  ;;  %v550_v56 = vshll.u32 %v442_v44, 16  ;;  %v445_v15 = vld [vmem:[%s2830_s8 + $0x38] sm:$0x1]  ;;  %s3693_s25 = smov (!%p389_p9, %s2817_s25), 15 }
  0x22   : > { %v509_v57 = vrot.slane %v507_v48, 4  ;;  %v512_v58 = vrot.slane %v510_v49, 5  ;;  %v579_v61 = vshrl.u32 %v446_v50, 16  ;;  %v582_v62 = vshll.u32 %v446_v50, 16  ;;  %v450_v20 = vld [vmem:[%s2830_s8 + $0x4c] sm:$0xf] }
  0x23   : > { %v522_v60 = vrot.slane %v520_v54, 4  ;;  %v505_v63 = vsel %vm2841_vm2, %v500_v42, %v504_v43  ;;  %v518_v1 = vrot.slane %v516_v53, 5  ;;  %v481_v2 = vsel %vm2841_vm2, %v476_v46, %v480_v47  ;;  %v443_v21 = vld [vmem:[%s2830_s8 + $0x30] sm:$0xf]  ;;  %v449_v26 = vld [vmem:[%s2830_s8 + $0x48] sm:$0xf] }
  0x24   : > { %v513_v0 = vor.u32 %v512_v58, %v509_v57  ;;  %v537_v3 = vor.u32 %v536_v52, %v533_v51  ;;  %v564_v4 = vshll.u32 %v444_v59, 16  ;;  %v568_v5 = vshrl.u32 %v444_v59, 16  ;;  %v451_v48 = vld [vmem:[%s2830_s8 + $0x50] sm:$0x1]  ;;  %v453_v53 = vld [vmem:[%s2830_s8 + $0x58] sm:$0xf] }
  0x25   : > { %v548_v7 = vrot.slane %v547_v55, 4  ;;  %v552_v8 = vrot.slane %v550_v56, 5  ;;  %v581_v11 = vrot.slane %v579_v61, 4  ;;  %v584_v12 = vrot.slane %v582_v62, 5  ;;  %v448_v55 = vld [vmem:[%s2830_s8 + $0x44] sm:$0x1] }
  0x26   : > { %v514_v9 = vrot.slane %v513_v0, 4  ;;  %v523_v13 = vor.u32 %v522_v60, %v518_v1  ;;  %v566_v16 = vrot.slane %v564_v4, 5  ;;  %v570_v17 = vrot.slane %v568_v5, 4  ;;  %v452_v56 = vld [vmem:[%s2830_s8 + $0x54] sm:$0xf]  ;;  %s2405_s13 = sshll.u32 %s3693_s25, 1 }
  0x27   : > { %v526_v18 = vshll.u32 %v439_v6, 16  ;;  %v538_v19 = vrot.slane %v537_v3, 4  ;;  %v553_v22 = vsel %vm2841_vm2, %v548_v7, %v552_v8  ;;  %v585_v27 = vor.u32 %v584_v12, %v581_v11 }
  0x28   : > { %656 = vrot.lane.b32.xlu1 %v505_v63, %s2748_s9  ;;  %v519_v14 = vsel %vm2841_vm2, %v514_v9, %v518_v1  ;;  %v524_v23 = vrot.slane %v523_v13, 4  ;;  %v588_v28 = vshll.u32 %v447_v10, 16  ;;  %v592_v29 = vshrl.u32 %v447_v10, 16  ;;  %v454_v10 = vld [vmem:[%s2830_s8 + $0x5c] sm:$0x1] }
  0x29   : > { %652 = vrot.lane.b32.xlu0 %v481_v2, %s2748_s9  ;;  %658 = vrot.lane.b32.xlu2 %v519_v14, %s2748_s9  ;;  %v528_v24 = vrot.slane %v526_v18, 5  ;;  %v574_v30 = vshll.u32 %v445_v15, 16  ;;  %v571_v31 = vor.u32 %v570_v17, %v566_v16  ;;  %v612_v32 = vshll.u32 %v450_v20, 16  ;;  %v715_v17 = vld [vmem:[%s2830_s8] sm:$0xe] }
  0x2a   : > { %v616_v33 = vshrl.u32 %v450_v20, 16  ;;  %v555_v34 = vshrl.u32 %v443_v21, 16  ;;  %v543_v35 = vsel %vm2841_vm2, %v538_v19, %v2849_v37  ;;  %v603_v36 = vshrl.u32 %v449_v26, 16  ;;  %v716_v18 = vld [vmem:[%s2830_s8 + $0x4] sm:$0xf] }
  0x2b   : > { %v606_v38 = vshll.u32 %v449_v26, 16  ;;  %v558_v39 = vshll.u32 %v443_v21, 16  ;;  %v529_v40 = vsel %vm2841_vm2, %v524_v23, %v528_v24  ;;  %v586_v42 = vrot.slane %v585_v27, 4 }
  0x2c   : > { %v557_v41 = vrot.slane %v555_v34, 4  ;;  %v590_v43 = vrot.slane %v588_v28, 5  ;;  %v572_v45 = vrot.slane %v571_v31, 4  ;;  %v576_v37 = vrot.slane %v574_v30, 5  ;;  %v720_v34 = vld [vmem:[%s2830_s8 + $0x14] sm:$0x1] }
  0x2d   : > { %v560_v44 = vrot.slane %v558_v39, 5  ;;  %v614_v46 = vrot.slane %v612_v32, 5  ;;  %v618_v47 = vrot.slane %v616_v33, 4  ;;  %v605_v49 = vrot.slane %v603_v36, 4 }
  0x2e   : > { %v608_v50 = vrot.slane %v606_v38, 5  ;;  %v594_v52 = vrot.slane %v592_v29, 4  ;;  %v591_v57 = vsel %vm2841_vm2, %v586_v42, %v590_v43  ;;  %v577_v58 = vsel %vm2841_vm2, %v572_v45, %v576_v37  ;;  %v719_v29 = vld [vmem:[%s2830_s8 + $0x10] sm:$0xf]  ;;  %v717_v38 = vld [vmem:[%s2830_s8 + $0x8] sm:$0x1] }
  0x2f   : > { %v561_v51 = vor.u32 %v560_v44, %v557_v41  ;;  %v619_v59 = vor.u32 %v618_v47, %v614_v46  ;;  %v622_v60 = vshll.u32 %v451_v48, 16  ;;  %v636_v62 = vshll.u32 %v453_v53, 16  ;;  %v722_v42 = vld [vmem:[%s2830_s8 + $0x1c] sm:$0xf]  ;;  %v725_v47 = vld [vmem:[%s2830_s8 + $0x28] sm:$0xf] }
  0x30   : > { %664 = vrot.lane.b32.xlu1 %v553_v22, %s2748_s9  ;;  %v609_v61 = vor.u32 %v608_v50, %v605_v49  ;;  %v640_v63 = vshrl.u32 %v453_v53, 16  ;;  %v595_v0 = vor.u32 %v594_v52, %v590_v43  ;;  %v598_v2 = vshll.u32 %v448_v55, 16  ;;  %v723_v49 = vld [vmem:[%s2830_s8 + $0x20] sm:$0x1] }
  0x31   : > { %662 = vrot.lane.b32.xlu0 %v543_v35, %s2748_s9  ;;  %660 = vrot.lane.b32.xlu2 %v529_v40, %s2748_s9  ;;  %v562_v54 = vrot.slane %v561_v51, 4  ;;  %v627_v3 = vshrl.u32 %v452_v56, 16  ;;  %v630_v4 = vshll.u32 %v452_v56, 16  ;;  %v620_v5 = vrot.slane %v619_v59, 4  ;;  %v718_v35 = vld [vmem:[%s2830_s8 + $0xc] sm:$0xe] }
  0x32   : > { %v624_v6 = vrot.slane %v622_v60, 5  ;;  %v610_v7 = vrot.slane %v609_v61, 4  ;;  %v638_v8 = vrot.slane %v636_v62, 5  ;;  %v642_v9 = vrot.slane %v640_v63, 4  ;;  %v721_v51 = vld [vmem:[%s2830_s8 + $0x18] sm:$0xe] }
  0x33   : > { %v567_v1 = vsel %vm2841_vm2, %v562_v54, %v566_v16  ;;  %v596_v11 = vrot.slane %v595_v0, 4  ;;  %v600_v12 = vrot.slane %v598_v2, 5  ;;  %v629_v13 = vrot.slane %v627_v3, 4  ;;  %v728_v56 = vld [vmem:[%s2830_s8 + $0x34] sm:$0xf] }
  0x34   : > { %v632_v14 = vrot.slane %v630_v4, 5  ;;  %v625_v15 = vsel %vm2841_vm2, %v620_v5, %v624_v6  ;;  %v615_v16 = vsel %vm2841_vm2, %v610_v7, %v614_v46  ;;  %v643_v19 = vor.u32 %v642_v9, %v638_v8  ;;  %v724_v46 = vld [vmem:[%s2830_s8 + $0x24] sm:$0xe]  ;;  %v729_v61 = vld [vmem:[%s2830_s8 + $0x38] sm:$0x1] }
  0x35   : > { %v646_v20 = vshll.u32 %v454_v10, 16  ;;  %v601_v21 = vsel %vm2841_vm2, %v596_v11, %v600_v12  ;;  %v2408_v23 = vrot.slane %v715_v17, 9  ;;  %v768_v24 = vrot.slane %v716_v18, 5  ;;  %v727_v62 = vld [vmem:[%s2830_s8 + $0x30] sm:$0xe] }
  0x36   : > { %v633_v22 = vor.u32 %v632_v14, %v629_v13  ;;  %v644_v27 = vrot.slane %v643_v19, 4  ;;  %v775_v32 = vrot.slane %v719_v29, 5  ;;  %v778_v40 = vrot.slane %v720_v34, 5  ;;  %v726_v0 = vld [vmem:[%s2830_s8 + $0x2c] sm:$0x1] }
  0x37   : > { %v648_v28 = vrot.slane %v646_v20, 5  ;;  %v769_v31 = vsel %vm2909_vm5, %v2408_v23, %v768_v24  ;;  %v2409_v41 = vrot.slane %v718_v35, 9  ;;  %v770_v43 = vrot.slane %v768_v24, 4  ;;  %v731_v4 = vld [vmem:[%s2830_s8 + $0x40] sm:$0xf] }
  0x38   : > { %670 = vrot.lane.b32.xlu1 %v591_v57, %s2748_s9  ;;  %v634_v30 = vrot.slane %v633_v22, 4  ;;  %v777_v39 = vrot.slane %v775_v32, 4  ;;  %v771_v44 = vrot.slane %v717_v38, 5  ;;  %v782_v48 = vrot.slane %v722_v42, 5  ;;  %v733_v9 = vld [vmem:[%s2830_s8 + $0x48] sm:$0xe] }
  0x39   : > { %668 = vrot.lane.b32.xlu0 %v577_v58, %s2748_s9  ;;  %666 = vrot.lane.b32.xlu2 %v567_v1, %s2748_s9  ;;  %v649_v33 = vsel %vm2841_vm2, %v644_v27, %v648_v28  ;;  %v776_v37 = vsel %vm2909_vm5, %v2409_v41, %v775_v32  ;;  %v2411_v52 = vrot.slane %v724_v46, 9  ;;  %v789_v53 = vrot.slane %v725_v47, 5  ;;  %v734_v10 = vld [vmem:[%s2830_s8 + $0x4c] sm:$0xf]  ;;  %v732_v12 = vld [vmem:[%s2830_s8 + $0x44] sm:$0x1] }
  0x3a   : > { %v639_v36 = vsel %vm2841_vm2, %v634_v30, %v638_v8  ;;  %v779_v45 = vsel %vm2909_vm5, %v777_v39, %v778_v40  ;;  %v772_v50 = vsel %vm2909_vm5, %v770_v43, %v771_v44  ;;  %v784_v54 = vrot.slane %v782_v48, 4  ;;  %v730_v14 = vld [vmem:[%s2830_s8 + $0x3c] sm:$0xe]  ;;  %v737_v19 = vld [vmem:[%s2830_s8 + $0x58] sm:$0xf] }
  0x3b   : > { %v785_v55 = vrot.slane %v723_v49, 5  ;;  %v2410_v57 = vrot.slane %v721_v51, 9  ;;  %v790_v58 = vsel %vm2909_vm5, %v2411_v52, %v789_v53  ;;  %v796_v59 = vrot.slane %v728_v56, 5  ;;  %v738_v24 = vld [vmem:[%s2830_s8 + $0x5c] sm:$0x1] }
  0x3c   : > { %v799_v2 = vrot.slane %v729_v61, 5  ;;  %v2412_v3 = vrot.slane %v727_v62, 9  ;;  %v791_v5 = vrot.slane %v789_v53, 4  ;;  %v792_v6 = vrot.slane %v726_v0, 5  ;;  %v736_v27 = vld [vmem:[%s2830_s8 + $0x54] sm:$0xe] }
  0x3d   : > { %v786_v60 = vsel %vm2909_vm5, %v784_v54, %v785_v55  ;;  %v783_v63 = vsel %vm2909_vm5, %v2410_v57, %v782_v48  ;;  %v798_v1 = vrot.slane %v796_v59, 4  ;;  %v803_v11 = vrot.slane %v731_v4, 5  ;;  %v735_v29 = vld [vmem:[%s2830_s8 + $0x50] sm:$0x1]  ;;  %v402_v39 = vld [vmem:[%s2830_s8 + $0x18] sm:$0xf] }
  0x3e   : > { %v797_v8 = vsel %vm2909_vm5, %v2412_v3, %v796_v59  ;;  %v793_v13 = vsel %vm2909_vm5, %v791_v5, %v792_v6  ;;  %v806_v18 = vrot.slane %v732_v12, 5  ;;  %v2413_v20 = vrot.slane %v730_v14, 9  ;;  %419 = vst.msk [vmem:[#allocation2 + $0x10] sm:$0xf] %vm414_vm6, %v402_v39  ;;  %v400_v40 = vld [vmem:[%s2830_s8 + $0xc] sm:$0xf] }
  0x3f   : > { %v800_v7 = vsel %vm2909_vm5, %v798_v1, %v799_v2  ;;  %v805_v17 = vrot.slane %v803_v11, 4  ;;  %v817_v22 = vrot.slane %v737_v19, 5  ;;  %v2415_v32 = vrot.slane %v736_v27, 9  ;;  %v398_v41 = vld [vmem:[%s2830_s8] sm:$0xf] }
  0x40   : > { %676 = vrot.lane.b32.xlu1 %v625_v15, %s2748_s9  ;;  %v2414_v15 = vrot.slane %v733_v9, 9  ;;  %v804_v28 = vsel %vm2909_vm5, %v2413_v20, %v803_v11  ;;  %v813_v34 = vrot.slane %v735_v29, 5  ;;  %417 = vst.msk [vmem:[#allocation2 + $0x8] sm:$0xf] %vm414_vm6, %v400_v40  ;;  %v2418_v42 = vld [vmem:[%s2830_s8 + $0x18] sm:$0xf] }
  0x41   : > { %674 = vrot.lane.b32.xlu0 %v615_v16, %s2748_s9  ;;  %672 = vrot.lane.b32.xlu2 %v601_v21, %s2748_s9  ;;  %v810_v16 = vrot.slane %v734_v10, 5  ;;  %v807_v23 = vsel %vm2909_vm5, %v805_v17, %v806_v18  ;;  %v819_v30 = vrot.slane %v817_v22, 4  ;;  %415 = vst.msk [vmem:[#allocation2] sm:$0xf] %vm414_vm6, %v398_v41  ;;  %v2417_v43 = vld [vmem:[%s2830_s8 + $0x10] sm:$0xf] }
  0x42   : > { %v2416_v44 = vld [vmem:[%s2830_s8 + $0xc] sm:$0xf]  ;;  %v399_v46 = vld [vmem:[%s2830_s8 + $0x4] sm:$0xf]  ;;  %v2421_v47 = vld [vmem:[%s2830_s8 + $0x28] sm:$0xf] }
  0x43   : > { %v811_v21 = vsel %vm2909_vm5, %v2414_v15, %v810_v16  ;;  %416 = vst.msk [vmem:[#allocation2 + $0x4] sm:$0xf] %vm414_vm6, %v399_v46  ;;  %v2420_v48 = vld [vmem:[%s2830_s8 + $0x24] sm:$0xf]  ;;  %v2419_v49 = vld [vmem:[%s2830_s8 + $0x1c] sm:$0xf] }
  0x44   : > { %v405_v51 = vld [vmem:[%s2830_s8 + $0x28] sm:$0xf]  ;;  %v404_v52 = vld [vmem:[%s2830_s8 + $0x24] sm:$0xf]  ;;  %v2424_v54 = vld [vmem:[%s2830_s8 + $0x3c] sm:$0xf] }
  0x45   : > { %422 = vst.msk [vmem:[#allocation2 + $0x1c] sm:$0xf] %vm414_vm6, %v405_v51  ;;  %v2423_v55 = vld [vmem:[%s2830_s8 + $0x34] sm:$0xf]  ;;  %v2422_v56 = vld [vmem:[%s2830_s8 + $0x30] sm:$0xf] }
  0x46   : > { %421 = vst.msk [vmem:[#allocation2 + $0x18] sm:$0xf] %vm414_vm6, %v404_v52  ;;  %v2431_v57 = vld [vmem:[%s2830_s8 + $0x10] sm:$0xf]  ;;  %v409_v59 = vld [vmem:[%s2830_s8 + $0x40] sm:$0xf] }
  0x47   : > { %426 = vst.msk [vmem:[#allocation2 + $0x2c] sm:$0xf] %vm414_vm6, %v409_v59  ;;  %v407_v61 = vld [vmem:[%s2830_s8 + $0x34] sm:$0xf]  ;;  %v1021_v0 = vshrl.u32 %v2431_v57, 16 }
  0x48   : > { %822 = vrot.lane.b32.xlu1 %v769_v31, %s2749_s10  ;;  %v820_v31 = vrot.slane %v738_v24, 5  ;;  %424 = vst.msk [vmem:[#allocation2 + $0x24] sm:$0xf] %vm414_vm6, %v407_v61  ;;  %v2427_v1 = vld [vmem:[%s2830_s8 + $0x4c] sm:$0xf] }
  0x49   : > { %680 = vrot.lane.b32.xlu0 %v649_v33, %s2748_s9  ;;  %678 = vrot.lane.b32.xlu2 %v639_v36, %s2748_s9  ;;  %v812_v33 = vrot.slane %v810_v16, 4  ;;  %v818_v36 = vsel %vm2909_vm5, %v2415_v32, %v817_v22  ;;  %v2426_v4 = vld [vmem:[%s2830_s8 + $0x48] sm:$0xf]  ;;  %v2425_v5 = vld [vmem:[%s2830_s8 + $0x40] sm:$0xf]  ;;  %s373_s9 = sadd.s32 1, %s3010_s12 }
  0x4a   : > { %v821_v35 = vsel %vm2909_vm5, %v819_v30, %v820_v31  ;;  %v2432_v6 = vld [vmem:[%s2830_s8 + $0x14] sm:$0x1]  ;;  %v2436_v11 = vld [vmem:[%s2830_s8 + $0x24] sm:$0xf]  ;;  %v2434_v15 = vld [vmem:[%s2830_s8 + $0x1c] sm:$0xf] }
  0x4b   : > { %v814_v38 = vsel %vm2909_vm5, %v812_v33, %v813_v34  ;;  %v412_v12 = vld [vmem:[%s2830_s8 + $0x54] sm:$0xf]  ;;  %v1027_v14 = vshll.u32 %v2432_v6, 16  ;;  %v411_v17 = vld [vmem:[%s2830_s8 + $0x4c] sm:$0xf]  ;;  %v1059_v22 = vshll.u32 %v2436_v11, 16 }
  0x4c   : > { %429 = vst.msk [vmem:[#allocation2 + $0x38] sm:$0xf] %vm414_vm6, %v412_v12  ;;  %v2433_v18 = vld [vmem:[%s2830_s8 + $0x18] sm:$0xf]  ;;  %v973_v24 = vld [vmem:[%s3055_s26] sm:$0xf] }
  0x4d   : > { %v1045_v29 = vshrl.u32 %v2434_v15, 16  ;;  %v2429_v30 = vld [vmem:[%s2830_s8 + $0x58] sm:$0xf]  ;;  %428 = vst.msk [vmem:[#allocation2 + $0x34] sm:$0xf] %vm414_vm6, %v411_v17  ;;  %v1032_v31 = vshrl.u32 %v2433_v18, 16 }
  0x4e   : > { %v1035_v32 = vshll.u32 %v2433_v18, 16  ;;  %v2428_v33 = vld [vmem:[%s2830_s8 + $0x54] sm:$0xf]  ;;  %v2437_v40 = vld [vmem:[%s2830_s8 + $0x28] sm:$0xf]  ;;  %p376_p8 = scmp.lt.s32.totalorder %s373_s9, 17 }
  0x4f   : > { %v1065_v52 = vshll.u32 %v2437_v40, 16  ;;  %v2438_v18 = vld [vmem:[%s2830_s8 + $0x2c] sm:$0x1] }
  0x50   : > { %828 = vrot.lane.b32.xlu1 %v779_v45, %s2749_s10  ;;  %v403_v45 = vld [vmem:[%s2830_s8 + $0x1c] sm:$0xf]  ;;  %v1037_v46 = vrot.slane %v1035_v32, 5  ;;  %s3691_s9 = smov (!%p376_p8, %s373_s9), 17 }
  0x51   : > { %826 = vrot.lane.b32.xlu0 %v776_v37, %s2749_s10  ;;  %824 = vrot.lane.b32.xlu2 %v772_v50, %s2749_s10  ;;  %420 = vst.msk [vmem:[#allocation2 + $0x14] sm:$0xf] %vm414_vm6, %v403_v45  ;;  %v401_v37 = vld [vmem:[%s2830_s8 + $0x10] sm:$0xf] }
  0x52   : > { %418 = vst.msk [vmem:[#allocation2 + $0xc] sm:$0xf] %vm414_vm6, %v401_v37  ;;  %v406_v50 = vld [vmem:[%s2830_s8 + $0x30] sm:$0xf]  ;;  %v1034_v37 = vrot.slane %v1032_v31, 4  ;;  %v1075_v31 = vshll.u32 %v2438_v18, 16 }
  0x53   : > { %423 = vst.msk [vmem:[#allocation2 + $0x20] sm:$0xf] %vm414_vm6, %v406_v50  ;;  %v2439_v45 = vld [vmem:[%s2830_s8 + $0x30] sm:$0xf] }
  0x54   : > { %v1038_v61 = vor.u32 %v1037_v46, %v1034_v37  ;;  %v1077_v46 = vrot.slane %v1075_v31, 5 }
  0x58   : > { %834 = vrot.lane.b32.xlu1 %v790_v58, %s2749_s10  ;;  %v2430_v58 = vld [vmem:[%s2830_s8 + $0xc] sm:$0xf] }
  0x59   : > { %832 = vrot.lane.b32.xlu0 %v786_v60, %s2749_s10  ;;  %830 = vrot.lane.b32.xlu2 %v783_v63, %s2749_s10  ;;  %v408_v60 = vld [vmem:[%s2830_s8 + $0x3c] sm:$0xf]  ;;  %v1017_v63 = vshll.u32 %v2431_v57, 16  ;;  %v1008_v2 = vshrl.u32 %v2430_v58, 16  ;;  %v1011_v3 = vshll.u32 %v2430_v58, 16  ;;  %v1083_v57 = vshll.u32 %v2439_v45, 16 }
  0x5a   : > { %425 = vst.msk [vmem:[#allocation2 + $0x28] sm:$0xf] %vm414_vm6, %v408_v60 }
  0x5b   : > { %v1010_v9 = vrot.slane %v1008_v2, 4  ;;  %v1013_v10 = vrot.slane %v1011_v3, 5  ;;  %v2441_v2 = vld [vmem:[%s2830_s8 + $0x38] sm:$0x1]  ;;  %v1085_v6 = vrot.slane %v1083_v57, 5 }
  0x5d   : > { %v1014_v27 = vor.u32 %v1013_v10, %v1010_v9  ;;  %v1039_v10 = vrot.slane %v1038_v61, 4 }
  0x5f   : > { %v1015_v39 = vrot.slane %v1014_v27, 4 }
  0x60   : > { %840 = vrot.lane.b32.xlu1 %v800_v7, %s2749_s10  ;;  %v3047_v7 = vrot.slane %v1017_v63, 5  ;;  %v974_v63 = vld [vmem:[%s3055_s26 + $0x4] sm:$0xf] }
  0x61   : > { %838 = vrot.lane.b32.xlu0 %v797_v8, %s2749_s10  ;;  %836 = vrot.lane.b32.xlu2 %v793_v13, %s2749_s10  ;;  %v1023_v8 = vrot.slane %v1021_v0, 4 }
  0x62   : > { %v1020_v58 = vsel %vm2841_vm2, %v1015_v39, %v3047_v7 }
  0x63   : > { %v1024_v19 = vor.u32 %v1023_v8, %v3047_v7 }
  0x65   : > { %v1025_v34 = vrot.slane %v1024_v19, 4  ;;  %v2442_v19 = vld [vmem:[%s2830_s8 + $0x3c] sm:$0xf] }
  0x66   : > { %v1104_v32 = vshrl.u32 %v2442_v19, 16 }
  0x68   : > { %846 = vrot.lane.b32.xlu1 %v811_v21, %s2749_s10  ;;  %v1056_v21 = vshrl.u32 %v2436_v11, 16  ;;  %v2448_v11 = vld [vmem:[%s2830_s8 + $0x54] sm:$0xf] }
  0x69   : > { %844 = vrot.lane.b32.xlu0 %v807_v23, %s2749_s10  ;;  %842 = vrot.lane.b32.xlu2 %v804_v28, %s2749_s10  ;;  %v410_v23 = vld [vmem:[%s2830_s8 + $0x48] sm:$0xf]  ;;  %v1041_v28 = vshll.u32 %v2434_v15, 16 }
  0x6a   : > { %427 = vst.msk [vmem:[#allocation2 + $0x30] sm:$0xf] %vm414_vm6, %v410_v23  ;;  %v1155_v23 = vshll.u32 %v2448_v11, 16 }
  0x6b   : > { %v3075_v41 = vrot.slane %v1041_v28, 5 }
  0x6c   : > { %v1157_v39 = vrot.slane %v1155_v23, 5 }
  0x6d   : > { %v1044_v27 = vsel %vm2841_vm2, %v1039_v10, %v3075_v41  ;;  %v2463_v10 = vld [vmem:[%s2830_s8 + $0x3c] sm:$0xe] }
  0x70   : > { %852 = vrot.lane.b32.xlu1 %v821_v35, %s2749_s10  ;;  %v1029_v35 = vrot.slane %v1027_v14, 5  ;;  %v2443_v14 = vld [vmem:[%s2830_s8 + $0x40] sm:$0xf] }
  0x71   : > { %850 = vrot.lane.b32.xlu0 %v818_v36, %s2749_s10  ;;  %848 = vrot.lane.b32.xlu2 %v814_v38, %s2749_s10  ;;  %v1058_v36 = vrot.slane %v1056_v21, 4  ;;  %v1061_v38 = vrot.slane %v1059_v22, 5  ;;  %v1152_v22 = vshrl.u32 %v2448_v11, 16  ;;  %v1113_v28 = vshll.u32 %v2443_v14, 16  ;;  %s2657_s10 = smul.u32 3, %s3691_s9 }
  0x72   : > { %v1030_v50 = vsel %vm2841_vm2, %v1025_v34, %v1029_v35 }
  0x73   : > { %v1062_v51 = vor.u32 %v1061_v38, %v1058_v36  ;;  %v1154_v38 = vrot.slane %v1152_v22, 4 }
  0x75   : > { %v1063_v0 = vrot.slane %v1062_v51, 4  ;;  %v1158_v51 = vor.u32 %v1157_v39, %v1154_v38  ;;  %v2505_v38 = vld [vmem:[%s2830_s8 + $0x4c] sm:$0xf] }
  0x78   : > { %920 = vrot.lane.b32.xlu1 %v2418_v42, %s2750_s11  ;;  %v1047_v42 = vrot.slane %v1045_v29, 4  ;;  %v1117_v29 = vshrl.u32 %v2443_v14, 16 }
  0x79   : > { %918 = vrot.lane.b32.xlu0 %v2417_v43, %s2750_s11  ;;  %916 = vrot.lane.b32.xlu2 %v2416_v44, %s2750_s11  ;;  %v2440_v44 = vld [vmem:[%s2830_s8 + $0x34] sm:$0xf] }
  0x7a   : > { %v1048_v59 = vor.u32 %v1047_v42, %v3075_v41  ;;  %v2449_v41 = vld [vmem:[%s2830_s8 + $0x58] sm:$0xf]  ;;  %v2444_v42 = vld [vmem:[%s2830_s8 + $0x44] sm:$0x1] }
  0x7c   : > { %v1049_v8 = vrot.slane %v1048_v59, 4  ;;  %v1159_v59 = vrot.slane %v1158_v51, 4 }
  0x80   : > { %926 = vrot.lane.b32.xlu1 %v2421_v47, %s2750_s11 }
  0x81   : > { %924 = vrot.lane.b32.xlu0 %v2420_v48, %s2750_s11  ;;  %922 = vrot.lane.b32.xlu2 %v2419_v49, %s2750_s11  ;;  %v2435_v48 = vld [vmem:[%s2830_s8 + $0x20] sm:$0x1]  ;;  %v413_v49 = vld [vmem:[%s2830_s8 + $0x58] sm:$0xf] }
  0x82   : > { %v1051_v60 = vshll.u32 %v2435_v48, 16  ;;  %430 = vst.msk [vmem:[#allocation2 + $0x3c] sm:$0xf] %vm414_vm6, %v413_v49 }
  0x83   : > { %v659_v53 = vpop.permute.xlu2 %658 }
  0x84   : > { %703 = vst.msk [vmem:[#allocation2 + $0x10] sm:$0xf] %vm698_vm7, %v659_v53  ;;  %v1053_v9 = vrot.slane %v1051_v60, 5 }
  0x88   : > { %932 = vrot.lane.b32.xlu1 %v2424_v54, %s2750_s11  ;;  %v1089_v54 = vshll.u32 %v2440_v44, 16 }
  0x89   : > { %930 = vrot.lane.b32.xlu0 %v2423_v55, %s2750_s11  ;;  %928 = vrot.lane.b32.xlu2 %v2422_v56, %s2750_s11  ;;  %v1093_v55 = vshrl.u32 %v2440_v44, 16  ;;  %v1080_v56 = vshrl.u32 %v2439_v45, 16  ;;  %v1119_v44 = vrot.slane %v1117_v29, 4 }
  0x8a   : > { %v3096_v3 = vrot.slane %v1089_v54, 5 }
  0x8b   : > { %v661_v62 = vpop.permute.xlu2 %660 }
  0x8c   : > { %704 = vst.msk [vmem:[#allocation2 + $0x14] sm:$0xf] %vm698_vm7, %v661_v62  ;;  %v1069_v62 = vshrl.u32 %v2437_v40, 16 }
  0x8e   : > { %v1071_v15 = vrot.slane %v1069_v62, 4 }
  0x90   : > { %938 = vrot.lane.b32.xlu1 %v2427_v1, %s2750_s11  ;;  %v1067_v1 = vrot.slane %v1065_v52, 5  ;;  %v1161_v52 = vshll.u32 %v2449_v41, 16 }
  0x91   : > { %936 = vrot.lane.b32.xlu0 %v2426_v4, %s2750_s11  ;;  %934 = vrot.lane.b32.xlu2 %v2425_v5, %s2750_s11  ;;  %v1095_v4 = vrot.slane %v1093_v55, 4  ;;  %v1082_v5 = vrot.slane %v1080_v56, 4  ;;  %v1123_v55 = vshll.u32 %v2444_v42, 16  ;;  %v1165_v56 = vshrl.u32 %v2449_v41, 16  ;;  %v2488_v41 = vld [vmem:[%s2830_s8 + $0x48] sm:$0xf] }
  0x92   : > { %v655_v13 = vpop.permute.xlu1 %654  ;;  %v1163_v60 = vrot.slane %v1161_v52, 5  ;;  %v1747_v52 = vld [vmem:[%s3055_s26 + $0x4] sm:$0xf] }
  0x93   : > { %701 = vst.msk [vmem:[#allocation2 + $0x8] sm:$0xf] %vm698_vm7, %v655_v13  ;;  %v651_v16 = vpop.permute.xlu0 %650  ;;  %v667_v20 = vpop.permute.xlu2 %666  ;;  %v1099_v13 = vshll.u32 %v2441_v2, 16  ;;  %v1086_v21 = vor.u32 %v1085_v6, %v1082_v5  ;;  %v2450_v5 = vld [vmem:[%s2830_s8 + $0x5c] sm:$0x1] }
  0x94   : > { %699 = vst.msk [vmem:[#allocation2] sm:$0xf] %vm698_vm7, %v651_v16  ;;  %v1068_v16 = vsel %vm2841_vm2, %v1063_v0, %v1067_v1  ;;  %v2464_v0 = vld [vmem:[%s2830_s8 + $0x40] sm:$0xf]  ;;  %v1164_v6 = vsel %vm2841_vm2, %v1159_v59, %v1163_v60 }
  0x95   : > { %707 = vst.msk [vmem:[#allocation2 + $0x20] sm:$0xf] %vm698_vm7, %v667_v20  ;;  %v1096_v20 = vor.u32 %v1095_v4, %v3096_v3  ;;  %v1101_v34 = vrot.slane %v1099_v13, 5  ;;  %v1087_v36 = vrot.slane %v1086_v21, 4  ;;  %v1171_v13 = vshll.u32 %v2450_v5, 16 }
  0x97   : > { %v1097_v35 = vrot.slane %v1096_v20, 4  ;;  %v1173_v21 = vrot.slane %v1171_v13, 5 }
  0x98   : > { %977 = vrot.lane.b32.xlu1 %v973_v24, %s2750_s11  ;;  %v1054_v24 = vsel %vm2841_vm2, %v1049_v8, %v1053_v9  ;;  %v2465_v9 = vld [vmem:[%s2830_s8 + $0x44] sm:$0x1] }
  0x99   : > { %942 = vrot.lane.b32.xlu0 %v2429_v30, %s2750_s11  ;;  %940 = vrot.lane.b32.xlu2 %v2428_v33, %s2750_s11  ;;  %v1072_v30 = vor.u32 %v1071_v15, %v1067_v1  ;;  %v1107_v33 = vshll.u32 %v2442_v19, 16  ;;  %v1342_v15 = vrot.slane %v2465_v9, 5  ;;  %v2470_v19 = vld [vmem:[%s2830_s8 + $0x58] sm:$0xf] }
  0x9a   : > { %v657_v43 = vpop.permute.xlu1 %656 }
  0x9b   : > { %702 = vst.msk [vmem:[#allocation2 + $0xc] sm:$0xf] %vm698_vm7, %v657_v43  ;;  %v653_v47 = vpop.permute.xlu0 %652  ;;  %v673_v53 = vpop.permute.xlu2 %672  ;;  %v1115_v43 = vrot.slane %v1113_v28, 5  ;;  %v1073_v37 = vrot.slane %v1072_v30, 4  ;;  %v1109_v48 = vrot.slane %v1107_v33, 5 }
  0x9c   : > { %700 = vst.msk [vmem:[#allocation2 + $0x4] sm:$0xf] %vm698_vm7, %v653_v47  ;;  %v1106_v47 = vrot.slane %v1104_v32, 4  ;;  %v2471_v28 = vld [vmem:[%s2830_s8 + $0x5c] sm:$0x1] }
  0x9d   : > { %710 = vst.msk [vmem:[#allocation2 + $0x2c] sm:$0xf] %vm698_vm7, %v673_v53  ;;  %v1092_v53 = vsel %vm2841_vm2, %v1087_v36, %v3096_v3  ;;  %v1120_v54 = vor.u32 %v1119_v44, %v1115_v43  ;;  %v1078_v57 = vsel %vm2841_vm2, %v1073_v37, %v1077_v46  ;;  %v1167_v3 = vrot.slane %v1165_v56, 4  ;;  %v2469_v30 = vld [vmem:[%s2830_s8 + $0x54] sm:$0xe] }
  0x9e   : > { %v1356_v33 = vrot.slane %v2471_v28, 5  ;;  %v2478_v36 = vrot.slane %v2469_v30, 9  ;;  %v1663_v37 = vshrl.u32 %v2505_v38, 16  ;;  %v2506_v56 = vld [vmem:[%s2830_s8 + $0x50] sm:$0x1] }
  0x9f   : > { %v1121_v62 = vrot.slane %v1120_v54, 4 }
  0xa0   : > { %1177 = vrot.lane.b32.xlu1 %v1030_v50, %s2751_s28  ;;  %v1102_v50 = vsel %vm2841_vm2, %v1097_v35, %v1101_v34  ;;  %v1746_v34 = vld [vmem:[%s3055_s26] sm:$0xf]  ;;  %v1665_v54 = vrot.slane %v1663_v37, 4 }
  0xa1   : > { %1175 = vrot.lane.b32.xlu0 %v1020_v58, %s2751_s28  ;;  %979 = vrot.lane.b32.xlu2 %v974_v63, %s2750_s11  ;;  %v1110_v58 = vor.u32 %v1109_v48, %v1106_v47  ;;  %v1125_v63 = vrot.slane %v1123_v55, 5  ;;  %v1750_v42 = vshrl.u32 %v1746_v34, 16  ;;  %s380_s11 = sadd.s32 %s2657_s10, %s2824_s27 }
  0xa2   : > { %v665_v7 = vpop.permute.xlu1 %664  ;;  %s2403_s12 = sshll.u32 %s380_s11, 2 }
  0xa3   : > { %706 = vst.msk [vmem:[#allocation2 + $0x1c] sm:$0xf] %vm698_vm7, %v665_v7  ;;  %v663_v12 = vpop.permute.xlu0 %662  ;;  %v679_v17 = vpop.permute.xlu2 %678  ;;  %v1111_v2 = vrot.slane %v1110_v58, 4  ;;  %v1339_v7 = vrot.slane %v2464_v0, 5  ;;  %v1126_v8 = vsel %vm2841_vm2, %v1121_v62, %v1125_v63  ;;  %v1759_v62 = vshll.u32 %v1747_v52, 16  ;;  %s3346_s14 = scalar_lea.vmem %s3670_s2, %s2403_s12 }
  0xa4   : > { %705 = vst.msk [vmem:[#allocation2 + $0x18] sm:$0xf] %vm698_vm7, %v663_v12  ;;  %v1168_v12 = vor.u32 %v1167_v3, %v1163_v60  ;;  %v1511_v60 = vld [vmem:[%s3055_s26 + $0x4] sm:$0xf]  ;;  %v1510_v63 = vld [vmem:[%s3055_s26] sm:$0xf] }
  0xa5   : > { %713 = vst.msk [vmem:[#allocation2 + $0x38] sm:$0xf] %vm698_vm7, %v679_v17  ;;  %v1116_v11 = vsel %vm2841_vm2, %v1111_v2, %v1115_v43  ;;  %v1341_v14 = vrot.slane %v1339_v7, 4  ;;  %v2476_v17 = vrot.slane %v2463_v10, 9  ;;  %v1753_v43 = vshll.u32 %v1746_v34, 16 }
  0xa6   : > { %v1169_v20 = vrot.slane %v1168_v12, 4  ;;  %v1763_v2 = vshrl.u32 %v1747_v52, 16  ;;  %v2489_v3 = vld [vmem:[%s2830_s8 + $0x4c] sm:$0xf] }
  0xa7   : > { %v1343_v23 = vsel %vm2909_vm5, %v1341_v14, %v1342_v15  ;;  %v2523_v10 = vld [vmem:[%s2830_s8 + $0x4c] sm:$0xf]  ;;  %v1748_v15 = vld [vmem:[%s3055_s26 + $0x8] sm:$0x1] }
  0xa8   : > { %1183 = vrot.lane.b32.xlu1 %v1068_v16, %s2751_s28  ;;  %v1174_v29 = vsel %vm2841_vm2, %v1169_v20, %v1173_v21  ;;  %v1765_v13 = vrot.slane %v1763_v2, 4  ;;  %v2522_v20 = vld [vmem:[%s2830_s8 + $0x48] sm:$0xe] }
  0xa9   : > { %1181 = vrot.lane.b32.xlu0 %v1054_v24, %s2751_s28  ;;  %1179 = vrot.lane.b32.xlu2 %v1044_v27, %s2751_s28  ;;  %v1340_v24 = vsel %vm2909_vm5, %v2476_v17, %v1339_v7  ;;  %v1353_v27 = vrot.slane %v2470_v19, 5  ;;  %v1882_v17 = vrot.slane %v2523_v10, 5  ;;  %v2524_v19 = vld [vmem:[%s2830_s8 + $0x50] sm:$0x1] }
  0xaa   : > { %v671_v40 = vpop.permute.xlu1 %670 }
  0xab   : > { %709 = vst.msk [vmem:[#allocation2 + $0x28] sm:$0xf] %vm698_vm7, %v671_v40  ;;  %v669_v45 = vpop.permute.xlu0 %668  ;;  %v825_v49 = vpop.permute.xlu2 %824  ;;  %v1355_v32 = vrot.slane %v1353_v27, 4  ;;  %v2504_v40 = vld [vmem:[%s2830_s8 + $0x48] sm:$0xf]  ;;  %v1354_v46 = vsel %vm2909_vm5, %v2478_v36, %v1353_v27  ;;  %v1885_v27 = vrot.slane %v2524_v19, 5 }
  0xac   : > { %708 = vst.msk [vmem:[#allocation2 + $0x24] sm:$0xf] %vm698_vm7, %v669_v45  ;;  %v1659_v45 = vshll.u32 %v2505_v38, 16  ;;  %v1650_v47 = vshrl.u32 %v2504_v40, 16  ;;  %v1653_v48 = vshll.u32 %v2504_v40, 16 }
  0xad   : > { %872 = vst.msk [vmem:[#allocation2 + $0x4] sm:$0xf] %vm870_vm8, %v825_v49  ;;  %v1357_v44 = vsel %vm2909_vm5, %v1355_v32, %v1356_v33  ;;  %v1752_v49 = vrot.slane %v1750_v42, 4  ;;  %v2451_v38 = vld [vmem:[%s2830_s8 + $0xc] sm:$0xe] }
  0xae   : > { %v1655_v58 = vrot.slane %v1653_v48, 5  ;;  %v2458_v48 = vld [vmem:[%s2830_s8 + $0x28] sm:$0xf]  ;;  %v2499_v19 = vld [vmem:[%s2830_s8 + $0x34] sm:$0xf] }
  0xb0   : > { %1189 = vrot.lane.b32.xlu1 %v1102_v50, %s2751_s28  ;;  %v1755_v50 = vrot.slane %v1753_v43, 5  ;;  %v1943_v43 = vld [vmem:[%s3055_s26] sm:$0xe] }
  0xb1   : > { %1187 = vrot.lane.b32.xlu0 %v1092_v53, %s2751_s28  ;;  %1185 = vrot.lane.b32.xlu2 %v1078_v57, %s2751_s28  ;;  %v1661_v53 = vrot.slane %v1659_v45, 5  ;;  %v1652_v57 = vrot.slane %v1650_v47, 4 }
  0xb2   : > { %v677_v61 = vpop.permute.xlu1 %676 }
  0xb3   : > { %712 = vst.msk [vmem:[#allocation2 + $0x34] sm:$0xf] %vm698_vm7, %v677_v61  ;;  %v675_v1 = vpop.permute.xlu0 %674  ;;  %v831_v4 = vpop.permute.xlu2 %830  ;;  %v1756_v61 = vor.u32 %v1755_v50, %v1752_v49  ;;  %v1666_v0 = vor.u32 %v1665_v54, %v1661_v53  ;;  %v2534_v50 = vrot.slane %v1943_v43, 9 }
  0xb4   : > { %711 = vst.msk [vmem:[#allocation2 + $0x30] sm:$0xf] %vm698_vm7, %v675_v1  ;;  %v1669_v1 = vshll.u32 %v2506_v56, 16  ;;  %v2457_v56 = vld [vmem:[%s2830_s8 + $0x24] sm:$0xe] }
  0xb5   : > { %875 = vst.msk [vmem:[#allocation2 + $0x10] sm:$0xf] %vm870_vm8, %v831_v4  ;;  %v1656_v4 = vor.u32 %v1655_v58, %v1652_v57  ;;  %v1757_v5 = vrot.slane %v1756_v61, 4  ;;  %v2453_v58 = vld [vmem:[%s2830_s8 + $0x14] sm:$0x1] }
  0xb6   : > { %v1671_v9 = vrot.slane %v1669_v1, 5  ;;  %v1314_v2 = vrot.slane %v2453_v58, 5  ;;  %v2517_v58 = vld [vmem:[%s2830_s8 + $0x34] sm:$0xf] }
  0xb7   : > { %v1657_v12 = vrot.slane %v1656_v4, 4 }
  0xb8   : > { %1199 = vrot.lane.b32.xlu1 %v1164_v6, %s2751_s28  ;;  %v1761_v6 = vrot.slane %v1759_v62, 5  ;;  %v2474_v62 = vrot.slane %v2457_v56, 9 }
  0xb9   : > { %1193 = vrot.lane.b32.xlu0 %v1126_v8, %s2751_s28  ;;  %1191 = vrot.lane.b32.xlu2 %v1116_v11, %s2751_s28  ;;  %v1667_v8 = vrot.slane %v1666_v0, 4  ;;  %v1662_v21 = vsel %vm2841_vm2, %v1657_v12, %v1661_v53  ;;  %v1325_v53 = vrot.slane %v2458_v48, 5  ;;  %v2511_v48 = vld [vmem:[%s2830_s8 + $0x1c] sm:$0xf] }
  0xba   : > { %v823_v16 = vpop.permute.xlu1 %822 }
  0xbb   : > { %871 = vst.msk [vmem:[#allocation2] sm:$0xf] %vm870_vm8, %v823_v16  ;;  %v681_v18 = vpop.permute.xlu0 %680  ;;  %v837_v22 = vpop.permute.xlu2 %836  ;;  %v1762_v16 = vsel %vm2841_vm2, %v1757_v5, %v1761_v6 }
  0xbc   : > { %714 = vst.msk [vmem:[#allocation2 + $0x3c] sm:$0xf] %vm698_vm7, %v681_v18  ;;  %v1672_v18 = vsel %vm2841_vm2, %v1667_v8, %v1671_v9  ;;  %v1326_v8 = vsel %vm2909_vm5, %v2474_v62, %v1325_v53 }
  0xbd   : > { %878 = vst.msk [vmem:[#allocation2 + $0x1c] sm:$0xf] %vm870_vm8, %v837_v22  ;;  %v1766_v22 = vor.u32 %v1765_v13, %v1761_v6 }
  0xbf   : > { %v1767_v32 = vrot.slane %v1766_v22, 4  ;;  %v2484_v22 = vld [vmem:[%s2830_s8 + $0x30] sm:$0xf] }
  0xc0   : > { %1376 = vrot.lane.b32.xlu1 %v1343_v23, %s2752_s29  ;;  %v1769_v23 = vshll.u32 %v1748_v15, 16  ;;  %v2494_v15 = vld [vmem:[%s2830_s8 + $0x20] sm:$0x1] }
  0xc1   : > { %1374 = vrot.lane.b32.xlu0 %v1340_v24, %s2752_s29  ;;  %1201 = vrot.lane.b32.xlu2 %v1174_v29, %s2751_s28  ;;  %v1884_v24 = vrot.slane %v1882_v17, 4  ;;  %v2532_v29 = vrot.slane %v2522_v20, 9 }
  0xc2   : > { %v829_v31 = vpop.permute.xlu1 %828  ;;  %v1771_v33 = vrot.slane %v1769_v23, 5 }
  0xc3   : > { %874 = vst.msk [vmem:[#allocation2 + $0xc] sm:$0xf] %vm870_vm8, %v829_v31  ;;  %v827_v35 = vpop.permute.xlu0 %826  ;;  %v843_v39 = vpop.permute.xlu2 %842  ;;  %v1944_v31 = vld [vmem:[%s3055_s26 + $0x4] sm:$0xf]  ;;  %v1883_v36 = vsel %vm2909_vm5, %v2532_v29, %v1882_v17  ;;  %v1611_v29 = vshll.u32 %v2499_v19, 16 }
  0xc4   : > { %873 = vst.msk [vmem:[#allocation2 + $0x8] sm:$0xf] %vm870_vm8, %v827_v35  ;;  %v1886_v35 = vsel %vm2909_vm5, %v1884_v24, %v1885_v27  ;;  %v1951_v40 = vrot.slane %v1944_v31, 5  ;;  %v1772_v42 = vsel %vm2841_vm2, %v1767_v32, %v1771_v33  ;;  %v1573_v24 = vshll.u32 %v2494_v15, 16  ;;  %v2481_v27 = vld [vmem:[%s2830_s8 + $0x1c] sm:$0xf] }
  0xc5   : > { %881 = vst.msk [vmem:[#allocation2 + $0x28] sm:$0xf] %vm870_vm8, %v843_v39  ;;  %v2452_v39 = vld [vmem:[%s2830_s8 + $0x10] sm:$0xf]  ;;  %v2480_v31 = vld [vmem:[%s2830_s8 + $0x18] sm:$0xf] }
  0xc6   : > { %v1311_v45 = vrot.slane %v2452_v39, 5  ;;  %v1952_v57 = vsel %vm2909_vm5, %v2534_v50, %v1951_v40  ;;  %v1613_v39 = vrot.slane %v1611_v29, 5 }
  0xc8   : > { %1477 = vrot.lane.b32.xlu1 %v2488_v41, %s2753_s30  ;;  %v1945_v41 = vld [vmem:[%s3055_s26 + $0x8] sm:$0x1]  ;;  %v1313_v1 = vrot.slane %v1311_v45, 4 }
  0xc9   : > { %1384 = vrot.lane.b32.xlu0 %v1357_v44, %s2752_s29  ;;  %1382 = vrot.lane.b32.xlu2 %v1354_v46, %s2752_s29  ;;  %v2472_v44 = vrot.slane %v2451_v38, 9  ;;  %v1953_v46 = vrot.slane %v1951_v40, 4  ;;  %v1954_v47 = vrot.slane %v1945_v41, 5 }
  0xca   : > { %v835_v51 = vpop.permute.xlu1 %834 }
  0xcb   : > { %877 = vst.msk [vmem:[#allocation2 + $0x18] sm:$0xf] %vm870_vm8, %v835_v51  ;;  %v833_v55 = vpop.permute.xlu0 %832  ;;  %v849_v59 = vpop.permute.xlu2 %848  ;;  %v1312_v52 = vsel %vm2909_vm5, %v2472_v44, %v1311_v45  ;;  %v1955_v54 = vsel %vm2909_vm5, %v1953_v46, %v1954_v47  ;;  %v2510_v47 = vld [vmem:[%s2830_s8 + $0x18] sm:$0xe] }
  0xcc   : > { %876 = vst.msk [vmem:[#allocation2 + $0x14] sm:$0xf] %vm870_vm8, %v833_v55  ;;  %v2459_v55 = vld [vmem:[%s2830_s8 + $0x2c] sm:$0x1] }
  0xcd   : > { %884 = vst.msk [vmem:[#allocation2 + $0x34] sm:$0xf] %vm870_vm8, %v849_v59  ;;  %v1327_v59 = vrot.slane %v1325_v53, 4  ;;  %v2528_v53 = vrot.slane %v2510_v47, 9 }
  0xd0   : > { %1516 = vrot.lane.b32.xlu1 %v1511_v60, %s2753_s30  ;;  %v1328_v60 = vrot.slane %v2459_v55, 5 }
  0xd1   : > { %1514 = vrot.lane.b32.xlu0 %v1510_v63, %s2753_s30  ;;  %1479 = vrot.lane.b32.xlu2 %v2489_v3, %s2753_s30  ;;  %v2493_v63 = vld [vmem:[%s2830_s8 + $0x1c] sm:$0xf]  ;;  %v2492_v3 = vld [vmem:[%s2830_s8 + $0x18] sm:$0xf] }
  0xd2   : > { %v841_v7 = vpop.permute.xlu1 %840  ;;  %v1329_v5 = vsel %vm2909_vm5, %v1327_v59, %v1328_v60  ;;  %v1563_v6 = vshll.u32 %v2493_v63, 16  ;;  %v1554_v9 = vshrl.u32 %v2492_v3, 16  ;;  %v1557_v10 = vshll.u32 %v2492_v3, 16  ;;  %v1232_v59 = vld [vmem:[%s3055_s26] sm:$0xf] }
  0xd3   : > { %880 = vst.msk [vmem:[#allocation2 + $0x24] sm:$0xf] %vm870_vm8, %v841_v7  ;;  %v839_v11 = vpop.permute.xlu0 %838  ;;  %v917_v14 = vpop.permute.xlu2 %916  ;;  %v1567_v7 = vshrl.u32 %v2493_v63, 16  ;;  %v2446_v63 = vld [vmem:[%s2830_s8 + $0x4c] sm:$0xf]  ;;  %v1868_v3 = vrot.slane %v2517_v58, 5 }
  0xd4   : > { %879 = vst.msk [vmem:[#allocation2 + $0x20] sm:$0xf] %vm870_vm8, %v839_v11  ;;  %v1315_v11 = vsel %vm2909_vm5, %v1313_v1, %v1314_v2  ;;  %v1565_v12 = vrot.slane %v1563_v6, 5  ;;  %v1559_v17 = vrot.slane %v1557_v10, 5  ;;  %v2445_v1 = vld [vmem:[%s2830_s8 + $0x48] sm:$0xf] }
  0xd5   : > { %959 = vst.msk [vmem:[#allocation2] sm:$0xf] %vm958_vm9, %v917_v14  ;;  %v1569_v13 = vrot.slane %v1567_v7, 4  ;;  %v2516_v7 = vld [vmem:[%s2830_s8 + $0x30] sm:$0xe]  ;;  %v1870_v15 = vrot.slane %v1868_v3, 4 }
  0xd7   : > { %v1570_v23 = vor.u32 %v1569_v13, %v1565_v12 }
  0xd8   : > { %1773 = vrot.lane.b32.xlu1 %v1762_v16, %s2754_s6  ;;  %v1556_v16 = vrot.slane %v1554_v9, 4  ;;  %v1141_v9 = vshrl.u32 %v2446_v63, 16 }
  0xd9   : > { %1715 = vrot.lane.b32.xlu0 %v1672_v18, %s2754_s6  ;;  %1713 = vrot.lane.b32.xlu2 %v1662_v21, %s2754_s6  ;;  %v2498_v21 = vld [vmem:[%s2830_s8 + $0x30] sm:$0xf] }
  0xda   : > { %v847_v28 = vpop.permute.xlu1 %846  ;;  %v1602_v32 = vshrl.u32 %v2498_v21, 16  ;;  %v1605_v33 = vshll.u32 %v2498_v21, 16  ;;  %v2447_v21 = vld [vmem:[%s2830_s8 + $0x50] sm:$0x1] }
  0xdb   : > { %883 = vst.msk [vmem:[#allocation2 + $0x30] sm:$0xf] %vm870_vm8, %v847_v28  ;;  %v845_v30 = vpop.permute.xlu0 %844  ;;  %v923_v34 = vpop.permute.xlu2 %922  ;;  %v1560_v28 = vor.u32 %v1559_v17, %v1556_v16  ;;  %v2530_v16 = vrot.slane %v2516_v7, 9 }
  0xdc   : > { %882 = vst.msk [vmem:[#allocation2 + $0x2c] sm:$0xf] %vm870_vm8, %v845_v30  ;;  %v1615_v30 = vshrl.u32 %v2499_v19, 16  ;;  %v1604_v43 = vrot.slane %v1602_v32, 4  ;;  %v1607_v44 = vrot.slane %v1605_v33, 5 }
  0xdd   : > { %962 = vst.msk [vmem:[#allocation2 + $0xc] sm:$0xf] %vm958_vm9, %v923_v34  ;;  %v1571_v34 = vrot.slane %v1570_v23, 4  ;;  %v1561_v38 = vrot.slane %v1560_v28, 4  ;;  %v1143_v23 = vrot.slane %v1141_v9, 4 }
  0xde   : > { %v1617_v40 = vrot.slane %v1615_v30, 4 }
  0xdf   : > { %v1566_v46 = vsel %vm2841_vm2, %v1561_v38, %v1565_v12  ;;  %v1131_v12 = vshll.u32 %v2445_v1, 16  ;;  %v1147_v38 = vshll.u32 %v2447_v21, 16 }
  0xe0   : > { %1912 = vrot.lane.b32.xlu1 %v1886_v35, %s2755_s7  ;;  %v1575_v35 = vrot.slane %v1573_v24, 5 }
  0xe1   : > { %1910 = vrot.lane.b32.xlu0 %v1883_v36, %s2755_s7  ;;  %1775 = vrot.lane.b32.xlu2 %v1772_v42, %s2754_s6  ;;  %v2500_v42 = vld [vmem:[%s2830_s8 + $0x38] sm:$0x1]  ;;  %v1133_v30 = vrot.slane %v1131_v12, 5 }
  0xe2   : > { %v853_v37 = vpop.permute.xlu1 %852  ;;  %v1621_v50 = vshll.u32 %v2500_v42, 16 }
  0xe3   : > { %886 = vst.msk [vmem:[#allocation2 + $0x3c] sm:$0xf] %vm870_vm8, %v853_v37  ;;  %v851_v49 = vpop.permute.xlu0 %850  ;;  %v929_v51 = vpop.permute.xlu2 %928  ;;  %v1576_v37 = vsel %vm2841_vm2, %v1571_v34, %v1575_v35  ;;  %v1869_v35 = vsel %vm2909_vm5, %v2530_v16, %v1868_v3 }
  0xe4   : > { %885 = vst.msk [vmem:[#allocation2 + $0x38] sm:$0xf] %vm870_vm8, %v851_v49  ;;  %v1618_v49 = vor.u32 %v1617_v40, %v1613_v39 }
  0xe5   : > { %965 = vst.msk [vmem:[#allocation2 + $0x18] sm:$0xf] %vm958_vm9, %v929_v51  ;;  %v2485_v51 = vld [vmem:[%s2830_s8 + $0x34] sm:$0xf] }
  0xe6   : > { %v1619_v56 = vrot.slane %v1618_v49, 4 }
  0xe8   : > { %1358 = vrot.lane.b32.xlu1 %v1312_v52, %s2752_s29  ;;  %v1608_v52 = vor.u32 %v1607_v44, %v1604_v43 }
  0xe9   : > { %1958 = vrot.lane.b32.xlu0 %v1955_v54, %s2755_s7  ;;  %1956 = vrot.lane.b32.xlu2 %v1952_v57, %s2755_s7  ;;  %v1854_v54 = vrot.slane %v2511_v48, 5  ;;  %v1623_v57 = vrot.slane %v1621_v50, 5 }
  0xea   : > { %v921_v61 = vpop.permute.xlu1 %920  ;;  %v1609_v62 = vrot.slane %v1608_v52, 4 }
  0xeb   : > { %961 = vst.msk [vmem:[#allocation2 + $0x8] sm:$0xf] %vm958_vm9, %v921_v61  ;;  %v919_v0 = vpop.permute.xlu0 %918  ;;  %v935_v4 = vpop.permute.xlu2 %934  ;;  %v2518_v61 = vld [vmem:[%s2830_s8 + $0x38] sm:$0x1]  ;;  %v1855_v2 = vsel %vm2909_vm5, %v2528_v53, %v1854_v54  ;;  %v1624_v6 = vsel %vm2841_vm2, %v1619_v56, %v1623_v57  ;;  %v2466_v56 = vld [vmem:[%s2830_s8 + $0x48] sm:$0xe] }
  0xec   : > { %960 = vst.msk [vmem:[#allocation2 + $0x4] sm:$0xf] %vm958_vm9, %v919_v0  ;;  %v1614_v10 = vsel %vm2841_vm2, %v1609_v62, %v1613_v39  ;;  %v1871_v13 = vrot.slane %v2518_v61, 5 }
  0xed   : > { %968 = vst.msk [vmem:[#allocation2 + $0x24] sm:$0xf] %vm958_vm9, %v935_v4  ;;  %v1236_v4 = vshrl.u32 %v1232_v59, 16 }
  0xee   : > { %v1872_v32 = vsel %vm2909_vm5, %v1870_v15, %v1871_v13 }
  0xef   : > { %v1238_v17 = vrot.slane %v1236_v4, 4 }
  0xf0   : > { %1368 = vrot.lane.b32.xlu1 %v1329_v5, %s2752_s29  ;;  %v1239_v5 = vshll.u32 %v1232_v59, 16 }
  0xf1   : > { %1366 = vrot.lane.b32.xlu0 %v1326_v8, %s2752_s29  ;;  %1360 = vrot.lane.b32.xlu2 %v1315_v11, %s2752_s29  ;;  %v1137_v8 = vshll.u32 %v2446_v63, 16  ;;  %v1128_v11 = vshrl.u32 %v2445_v1, 16  ;;  %v2477_v63 = vrot.slane %v2466_v56, 9  ;;  %v1416_v1 = vld [vmem:[%s3055_s26 + $0x4] sm:$0xf] }
  0xf2   : > { %v927_v14 = vpop.permute.xlu1 %926  ;;  %v1423_v7 = vrot.slane %v1416_v1, 5  ;;  %v2526_v56 = vld [vmem:[%s2830_s8 + $0x58] sm:$0xf]  ;;  %v2527_v1 = vld [vmem:[%s2830_s8 + $0x5c] sm:$0x1] }
  0xf3   : > { %964 = vst.msk [vmem:[#allocation2 + $0x14] sm:$0xf] %vm958_vm9, %v927_v14  ;;  %v925_v18 = vpop.permute.xlu0 %924  ;;  %v941_v20 = vpop.permute.xlu2 %940  ;;  %v2512_v14 = vld [vmem:[%s2830_s8 + $0x20] sm:$0x1]  ;;  %v1130_v29 = vrot.slane %v1128_v11, 4 }
  0xf4   : > { %963 = vst.msk [vmem:[#allocation2 + $0x10] sm:$0xf] %vm958_vm9, %v925_v18  ;;  %v1241_v18 = vrot.slane %v1239_v5, 5  ;;  %v1857_v28 = vrot.slane %v2512_v14, 5  ;;  %v1425_v12 = vrot.slane %v1423_v7, 4 }
  0xf5   : > { %971 = vst.msk [vmem:[#allocation2 + $0x30] sm:$0xf] %vm958_vm9, %v941_v20  ;;  %v1233_v20 = vld [vmem:[%s3055_s26 + $0x4] sm:$0xf]  ;;  %v1781_v14 = vld [vmem:[%s3346_s14] sm:$0xf] }
  0xf6   : > { %v1242_v33 = vor.u32 %v1241_v18, %v1238_v17  ;;  %v1245_v34 = vshll.u32 %v1233_v20, 16  ;;  %v1249_v39 = vshrl.u32 %v1233_v20, 16  ;;  %v2508_v17 = vld [vmem:[%s2830_s8 + $0x58] sm:$0xf]  ;;  %v2490_v20 = vld [vmem:[%s2830_s8 + $0x54] sm:$0xf] }
  0xf7   : > { %v1785_v21 = vshrl.u32 %v1781_v14, 16 }
  0xf8   : > { %1469 = vrot.lane.b32.xlu1 %v2484_v22, %s2753_s30  ;;  %v1139_v22 = vrot.slane %v1137_v8, 5  ;;  %v1243_v42 = vrot.slane %v1242_v33, 4  ;;  %v1247_v43 = vrot.slane %v1245_v34, 5  ;;  %v1251_v49 = vrot.slane %v1249_v39, 4  ;;  %v1417_v8 = vld [vmem:[%s3055_s26 + $0x8] sm:$0x1] }
  0xf9   : > { %1463 = vrot.lane.b32.xlu0 %v2481_v27, %s2753_s30  ;;  %1461 = vrot.lane.b32.xlu2 %v2480_v31, %s2753_s30  ;;  %v1856_v27 = vrot.slane %v1854_v54, 4  ;;  %v1426_v13 = vrot.slane %v1417_v8, 5  ;;  %v1782_v34 = vld [vmem:[%s3346_s14 + $0x4] sm:$0xf]  ;;  %v2509_v39 = vld [vmem:[%s2830_s8 + $0x5c] sm:$0x1] }
  0xfa   : > { %v933_v36 = vpop.permute.xlu1 %932  ;;  %v1248_v52 = vsel %vm2841_vm2, %v1243_v42, %v1247_v43  ;;  %v1252_v58 = vor.u32 %v1251_v49, %v1247_v43  ;;  %v1524_v43 = vld [vmem:[%s3346_s14 + $0x4] sm:$0xf]  ;;  %v2491_v49 = vld [vmem:[%s2830_s8 + $0x58] sm:$0xf] }
  0xfb   : > { %967 = vst.msk [vmem:[#allocation2 + $0x20] sm:$0xf] %vm958_vm9, %v933_v36  ;;  %v931_v41 = vpop.permute.xlu0 %930  ;;  %v980_v45 = vpop.permute.xlu2 %979  ;;  %v1144_v36 = vor.u32 %v1143_v23, %v1139_v22  ;;  %v1858_v40 = vsel %vm2909_vm5, %v1856_v27, %v1857_v28  ;;  %v1427_v23 = vsel %vm2909_vm5, %v1425_v12, %v1426_v13  ;;  %v1687_v27 = vshrl.u32 %v2508_v17, 16 }
  0xfc   : > { %966 = vst.msk [vmem:[#allocation2 + $0x1c] sm:$0xf] %vm958_vm9, %v931_v41  ;;  %v1134_v41 = vor.u32 %v1133_v30, %v1130_v29 }
  0xfd   : > { %985 = vst.msk [vmem:[#allocation2 + $0x3c] sm:$0xf] %vm958_vm9, %v980_v45  ;;  %v1145_v45 = vrot.slane %v1144_v36, 4  ;;  %v1689_v36 = vrot.slane %v1687_v27, 4 }
  0xfe   : > { %v1135_v48 = vrot.slane %v1134_v41, 4 }
 0x100   : > { %1699 = vrot.lane.b32.xlu1 %v1576_v37, %s2754_s6  ;;  %v1149_v37 = vrot.slane %v1147_v38, 5  ;;  %v1140_v57 = vsel %vm2841_vm2, %v1135_v48, %v1139_v22  ;;  %v1788_v22 = vshll.u32 %v1781_v14, 16  ;;  %v1798_v48 = vshrl.u32 %v1782_v34, 16 }
 0x101   : > { %1697 = vrot.lane.b32.xlu0 %v1566_v46, %s2754_s6  ;;  %1471 = vrot.lane.b32.xlu2 %v2485_v51, %s2753_s30  ;;  %v2467_v46 = vld [vmem:[%s2830_s8 + $0x4c] sm:$0xf]  ;;  %v1234_v51 = vld [vmem:[%s3055_s26 + $0x8] sm:$0x1] }
 0x102   : > { %v939_v55 = vpop.permute.xlu1 %938  ;;  %v1346_v53 = vrot.slane %v2467_v46, 5  ;;  %v1150_v54 = vsel %vm2841_vm2, %v1145_v45, %v1149_v37  ;;  %v1255_v59 = vshll.u32 %v1234_v51, 16  ;;  %v1794_v45 = vshll.u32 %v1782_v34, 16  ;;  %v1523_v37 = vld [vmem:[%s3346_s14] sm:$0xf] }
 0x103   : > { %970 = vst.msk [vmem:[#allocation2 + $0x2c] sm:$0xf] %vm958_vm9, %v939_v55  ;;  %v937_v60 = vpop.permute.xlu0 %936  ;;  %v1180_v0 = vpop.permute.xlu2 %1179  ;;  %v2468_v55 = vld [vmem:[%s2830_s8 + $0x50] sm:$0x1] }
 0x104   : > { %969 = vst.msk [vmem:[#allocation2 + $0x28] sm:$0xf] %vm958_vm9, %v937_v60  ;;  %v1348_v60 = vrot.slane %v1346_v53, 4  ;;  %v1349_v61 = vrot.slane %v2468_v55, 5  ;;  %v1257_v3 = vrot.slane %v1255_v59, 5  ;;  %v1800_v59 = vrot.slane %v1798_v48, 4 }
 0x105   : > { %1220 = vst.msk [vmem:[#allocation2 + $0x8] sm:$0xf] %vm1217_vm10, %v1180_v0 }
 0x106   : > { %v1350_v5 = vsel %vm2909_vm5, %v1348_v60, %v1349_v61  ;;  %v1783_v61 = vld [vmem:[%s3346_s14 + $0x8] sm:$0x1] }
 0x108   : > { %1894 = vrot.lane.b32.xlu1 %v1855_v2, %s2755_s7  ;;  %v1253_v2 = vrot.slane %v1252_v58, 4 }
 0x109   : > { %1707 = vrot.lane.b32.xlu0 %v1624_v6, %s2754_s6  ;;  %1705 = vrot.lane.b32.xlu2 %v1614_v10, %s2754_s6  ;;  %v1347_v6 = vsel %vm2909_vm5, %v2477_v63, %v1346_v53  ;;  %v1415_v10 = vld [vmem:[%s3055_s26] sm:$0xe]  ;;  %v1889_v63 = vrot.slane %v2526_v56, 5 }
 0x10a   : > { %v978_v19 = vpop.permute.xlu1 %977  ;;  %v1258_v9 = vsel %vm2841_vm2, %v1253_v2, %v1257_v3  ;;  %v2479_v16 = vrot.slane %v1415_v10, 9  ;;  %v2525_v2 = vld [vmem:[%s2830_s8 + $0x54] sm:$0xe] }
 0x10b   : > { %984 = vst.msk [vmem:[#allocation2 + $0x38] sm:$0xf] %vm958_vm9, %v978_v19  ;;  %v943_v24 = vpop.permute.xlu0 %942  ;;  %v1186_v31 = vpop.permute.xlu2 %1185  ;;  %v2507_v19 = vld [vmem:[%s2830_s8 + $0x54] sm:$0xf] }
 0x10c   : > { %972 = vst.msk [vmem:[#allocation2 + $0x34] sm:$0xf] %vm958_vm9, %v943_v24  ;;  %v1683_v24 = vshll.u32 %v2508_v17, 16  ;;  %v1424_v28 = vsel %vm2909_vm5, %v2479_v16, %v1423_v7  ;;  %v1674_v29 = vshrl.u32 %v2507_v19, 16  ;;  %v1677_v30 = vshll.u32 %v2507_v19, 16 }
 0x10d   : > { %1223 = vst.msk [vmem:[#allocation2 + $0x14] sm:$0xf] %vm1217_vm10, %v1186_v31  ;;  %v1787_v31 = vrot.slane %v1785_v21, 4  ;;  %v1892_v7 = vrot.slane %v2527_v1, 5  ;;  %v2454_v17 = vld [vmem:[%s2830_s8 + $0x18] sm:$0xe] }
 0x10e   : > { %v1679_v41 = vrot.slane %v1677_v30, 5  ;;  %v2461_v30 = vld [vmem:[%s2830_s8 + $0x34] sm:$0xf] }
 0x110   : > { %1904 = vrot.lane.b32.xlu1 %v1872_v32, %s2755_s7  ;;  %v1790_v32 = vrot.slane %v1788_v22, 5  ;;  %v1964_v22 = vld [vmem:[%s3346_s14] sm:$0xe] }
 0x111   : > { %1902 = vrot.lane.b32.xlu0 %v1869_v35, %s2755_s7  ;;  %1896 = vrot.lane.b32.xlu2 %v1858_v40, %s2755_s7  ;;  %v1685_v35 = vrot.slane %v1683_v24, 5  ;;  %v1676_v40 = vrot.slane %v1674_v29, 4 }
 0x112   : > { %v1178_v44 = vpop.permute.xlu1 %1177 }
 0x113   : > { %1219 = vst.msk [vmem:[#allocation2 + $0x4] sm:$0xf] %vm1217_vm10, %v1178_v44  ;;  %v1176_v47 = vpop.permute.xlu0 %1175  ;;  %v1192_v50 = vpop.permute.xlu2 %1191  ;;  %v1791_v44 = vor.u32 %v1790_v32, %v1787_v31  ;;  %v1690_v46 = vor.u32 %v1689_v36, %v1685_v35  ;;  %v2535_v32 = vrot.slane %v1964_v22, 9  ;;  %v2503_v22 = vld [vmem:[%s2830_s8 + $0x44] sm:$0x1] }
 0x114   : > { %1218 = vst.msk [vmem:[#allocation2] sm:$0xf] %vm1217_vm10, %v1176_v47  ;;  %v1693_v47 = vshll.u32 %v2509_v39, 16  ;;  %v2460_v39 = vld [vmem:[%s2830_s8 + $0x30] sm:$0xe] }
 0x115   : > { %1226 = vst.msk [vmem:[#allocation2 + $0x20] sm:$0xf] %vm1217_vm10, %v1192_v50  ;;  %v1680_v50 = vor.u32 %v1679_v41, %v1676_v40  ;;  %v1792_v51 = vrot.slane %v1791_v44, 4  ;;  %v2456_v41 = vld [vmem:[%s2830_s8 + $0x20] sm:$0x1] }
 0x116   : > { %v1695_v55 = vrot.slane %v1693_v47, 5  ;;  %v1321_v48 = vrot.slane %v2456_v41, 5 }
 0x117   : > { %v1681_v58 = vrot.slane %v1680_v50, 4 }
 0x118   : > { %1259 = vrot.lane.b32.xlu1 %v1248_v52, %s2751_s28  ;;  %v1796_v52 = vrot.slane %v1794_v45, 5  ;;  %v2475_v45 = vrot.slane %v2460_v39, 9 }
 0x119   : > { %1197 = vrot.lane.b32.xlu0 %v1150_v54, %s2751_s28  ;;  %1195 = vrot.lane.b32.xlu2 %v1140_v57, %s2751_s28  ;;  %v1691_v54 = vrot.slane %v1690_v46, 4  ;;  %v1686_v3 = vsel %vm2841_vm2, %v1681_v58, %v1685_v35  ;;  %v1332_v35 = vrot.slane %v2461_v30, 5 }
 0x11a   : > { %v1184_v62 = vpop.permute.xlu1 %1183 }
 0x11b   : > { %1222 = vst.msk [vmem:[#allocation2 + $0x10] sm:$0xf] %vm1217_vm10, %v1184_v62  ;;  %v1182_v0 = vpop.permute.xlu0 %1181  ;;  %v1202_v4 = vpop.permute.xlu2 %1201  ;;  %v1797_v62 = vsel %vm2841_vm2, %v1792_v51, %v1796_v52 }
 0x11c   : > { %1221 = vst.msk [vmem:[#allocation2 + $0xc] sm:$0xf] %vm1217_vm10, %v1182_v0  ;;  %v1696_v0 = vsel %vm2841_vm2, %v1691_v54, %v1695_v55  ;;  %v1333_v54 = vsel %vm2909_vm5, %v2475_v45, %v1332_v35  ;;  %v2756_v55 = vmov 0  }
 0x11d   : > { %1231 = vst.msk [vmem:[#allocation2 + $0x34] sm:$0xf] %vm1217_vm10, %v1202_v4  ;;  %v1801_v4 = vor.u32 %v1800_v59, %v1796_v52 }
 0x11f   : > { %v1802_v12 = vrot.slane %v1801_v4, 4  ;;  %v2501_v4 = vld [vmem:[%s2830_s8 + $0x3c] sm:$0xf] }
 0x120   : > { %1380 = vrot.lane.b32.xlu1 %v1350_v5, %s2752_s29  ;;  %v1804_v5 = vshll.u32 %v1783_v61, 16 }
 0x121   : > { %1378 = vrot.lane.b32.xlu0 %v1347_v6, %s2752_s29  ;;  %1261 = vrot.lane.b32.xlu2 %v1258_v9, %s2751_s28  ;;  %v1891_v6 = vrot.slane %v1889_v63, 4  ;;  %v2533_v9 = vrot.slane %v2525_v2, 9  ;;  %v2502_v2 = vld [vmem:[%s2830_s8 + $0x40] sm:$0xf] }
 0x122   : > { %v1190_v11 = vpop.permute.xlu1 %1189  ;;  %v1806_v13 = vrot.slane %v1804_v5, 5  ;;  %v2486_v5 = vld [vmem:[%s2830_s8 + $0x3c] sm:$0xf] }
 0x123   : > { %1225 = vst.msk [vmem:[#allocation2 + $0x1c] sm:$0xf] %vm1217_vm10, %v1190_v11  ;;  %v1188_v15 = vpop.permute.xlu0 %1187  ;;  %v1383_v18 = vpop.permute.xlu2 %1382  ;;  %v1965_v11 = vld [vmem:[%s3346_s14 + $0x4] sm:$0xf]  ;;  %v1890_v16 = vsel %vm2909_vm5, %v2533_v9, %v1889_v63 }
 0x124   : > { %1224 = vst.msk [vmem:[#allocation2 + $0x18] sm:$0xf] %vm1217_vm10, %v1188_v15  ;;  %v1893_v15 = vsel %vm2909_vm5, %v1891_v6, %v1892_v7  ;;  %v1972_v19 = vrot.slane %v1965_v11, 5  ;;  %v1807_v21 = vsel %vm2841_vm2, %v1802_v12, %v1806_v13  ;;  %v1639_v11 = vshrl.u32 %v2502_v2, 16  ;;  %v2482_v12 = vld [vmem:[%s2830_s8 + $0x24] sm:$0xf] }
 0x125   : > { %v1626_v13 = vshrl.u32 %v2501_v4, 16 }
 0x126   : > { %v1973_v40 = vsel %vm2909_vm5, %v2535_v32, %v1972_v19 }
 0x128   : > { %1481 = vrot.lane.b32.xlu1 %v2490_v20, %s2753_s30  ;;  %v1966_v20 = vld [vmem:[%s3346_s14 + $0x8] sm:$0x1]  ;;  %s2406_s14 = sshll.u32 %s3689_s19, 5 }
 0x129   : > { %1430 = vrot.lane.b32.xlu0 %v1427_v23, %s2752_s29  ;;  %1428 = vrot.lane.b32.xlu2 %v1424_v28, %s2752_s29  ;;  %v2473_v23 = vrot.slane %v2454_v17, 9  ;;  %v1974_v28 = vrot.slane %v1972_v19, 4  ;;  %v1975_v29 = vrot.slane %v1966_v20, 5  ;;  %v1641_v20 = vrot.slane %v1639_v11, 4 }
 0x12a   : > { %v1200_v33 = vpop.permute.xlu1 %1199 }
 0x12b   : > { %1230 = vst.msk [vmem:[#allocation2 + $0x30] sm:$0xf] %vm1217_vm10, %v1200_v33  ;;  %v1194_v38 = vpop.permute.xlu0 %1193  ;;  %v1480_v42 = vpop.permute.xlu2 %1479  ;;  %v1976_v36 = vsel %vm2909_vm5, %v1974_v28, %v1975_v29  ;;  %v2513_v29 = vld [vmem:[%s2830_s8 + $0x24] sm:$0xe] }
 0x12c   : > { %1227 = vst.msk [vmem:[#allocation2 + $0x24] sm:$0xf] %vm1217_vm10, %v1194_v38  ;;  %v2462_v38 = vld [vmem:[%s2830_s8 + $0x38] sm:$0x1] }
 0x12d   : > { %1413 = vst.msk [vmem:[#allocation2 + $0x30] sm:$0xf] %vm1400_vm11, %v1383_v18  ;;  %v2455_v18 = vld [vmem:[%s2830_s8 + $0x1c] sm:$0xf] }
 0x12e   : > { %v1318_v24 = vrot.slane %v2455_v18, 5 }
 0x130   : > { %1529 = vrot.lane.b32.xlu1 %v1524_v43, %s2753_s30  ;;  %v1319_v34 = vsel %vm2909_vm5, %v2473_v23, %v1318_v24  ;;  %v1335_v43 = vrot.slane %v2462_v38, 5  ;;  %v1320_v47 = vrot.slane %v1318_v24, 4  ;;  %v1628_v23 = vrot.slane %v1626_v13, 4 }
 0x131   : > { %1527 = vrot.lane.b32.xlu0 %v1523_v37, %s2753_s30  ;;  %1483 = vrot.lane.b32.xlu2 %v2491_v49, %s2753_s30  ;;  %v2496_v37 = vld [vmem:[%s2830_s8 + $0x28] sm:$0xf]  ;;  %v2495_v49 = vld [vmem:[%s2830_s8 + $0x24] sm:$0xf] }
 0x132   : > { %v1377_v53 = vpop.permute.xlu1 %1376  ;;  %v1587_v52 = vshll.u32 %v2496_v37, 16  ;;  %v1578_v56 = vshrl.u32 %v2495_v49, 16  ;;  %v1322_v58 = vsel %vm2909_vm5, %v1320_v47, %v1321_v48  ;;  %v2521_v48 = vld [vmem:[%s2830_s8 + $0x44] sm:$0x1] }
 0x133   : > { %1410 = vst.msk [vmem:[#allocation2 + $0x24] sm:$0xf] %vm1400_vm11, %v1377_v53  ;;  %v1375_v57 = vpop.permute.xlu0 %1374  ;;  %v1714_v60 = vpop.permute.xlu2 %1713  ;;  %v1591_v53 = vshrl.u32 %v2496_v37, 16 }
 0x134   : > { %1409 = vst.msk [vmem:[#allocation2 + $0x20] sm:$0xf] %vm1400_vm11, %v1375_v57  ;;  %v1581_v57 = vshll.u32 %v2495_v49, 16  ;;  %v1589_v59 = vrot.slane %v1587_v52, 5  ;;  %v1580_v63 = vrot.slane %v1578_v56, 4 }
 0x135   : > { %1507 = vst.msk [vmem:[#allocation2 + $0x24] sm:$0xf] %vm1497_vm12, %v1480_v42  ;;  %v1334_v42 = vrot.slane %v1332_v35, 4  ;;  %v2519_v49 = vld [vmem:[%s2830_s8 + $0x3c] sm:$0xe] }
 0x136   : > { %v2531_v56 = vrot.slane %v2519_v49, 9 }
 0x137   : > { %v1336_v51 = vsel %vm2909_vm5, %v1334_v42, %v1335_v43  ;;  %v2520_v42 = vld [vmem:[%s2830_s8 + $0x40] sm:$0xf] }
 0x138   : > { %1808 = vrot.lane.b32.xlu1 %v1797_v62, %s2754_s6  ;;  %v2497_v62 = vld [vmem:[%s2830_s8 + $0x2c] sm:$0x1] }
 0x139   : > { %1719 = vrot.lane.b32.xlu0 %v1696_v0, %s2754_s6  ;;  %1717 = vrot.lane.b32.xlu2 %v1686_v3, %s2754_s6  ;;  %v1583_v0 = vrot.slane %v1581_v57, 5  ;;  %v1597_v7 = vshll.u32 %v2497_v62, 16 }
 0x13a   : > { %v1478_v8 = vpop.permute.xlu1 %1477 }
 0x13b   : > { %1506 = vst.msk [vmem:[#allocation2 + $0x20] sm:$0xf] %vm1497_vm12, %v1478_v8  ;;  %v1385_v10 = vpop.permute.xlu0 %1384  ;;  %v1776_v14 = vpop.permute.xlu2 %1775  ;;  %v2483_v8 = vld [vmem:[%s2830_s8 + $0x28] sm:$0xf]  ;;  %v1584_v9 = vor.u32 %v1583_v0, %v1580_v63 }
 0x13c   : > { %1414 = vst.msk [vmem:[#allocation2 + $0x34] sm:$0xf] %vm1400_vm11, %v1385_v10  ;;  %v1635_v10 = vshll.u32 %v2502_v2, 16 }
 0x13d   : > { %1742 = vst.msk [vmem:[#allocation2 + $0x20] sm:$0xf] %vm1733_vm13, %v1714_v60  ;;  %v1593_v60 = vrot.slane %v1591_v53, 4  ;;  %v1585_v18 = vrot.slane %v1584_v9, 4  ;;  %v1878_v53 = vrot.slane %v2521_v48, 5 }
 0x13e   : > { %v1637_v19 = vrot.slane %v1635_v10, 5  ;;  %v2629_v10 = vld [vmem:[%s3671_s3 + $0x38] sm:$0xff] }
 0x13f   : > { %v1594_v6 = vor.u32 %v1593_v60, %v1589_v59  ;;  %v1590_v30 = vsel %vm2841_vm2, %v1585_v18, %v1589_v59  ;;  %2631 = vmatpush.bf16.msra.mxu2 %v2629_v10  ;;  %2632 = vmatpush.bf16.msra.mxu3 %v2629_v10 }
 0x140   : > { %1916 = vrot.lane.b32.xlu1 %v1893_v15, %s2755_s7  ;;  %v1642_v32 = vor.u32 %v1641_v20, %v1637_v19  ;;  %2134 = vmatpush.bf16.msra.mxu0 %v2629_v10  ;;  %v2625_v20 = vld [vmem:[%s3671_s3 + $0x18] sm:$0xff] }
 0x141   : > { %1914 = vrot.lane.b32.xlu0 %v1890_v16, %s2755_s7  ;;  %1810 = vrot.lane.b32.xlu2 %v1807_v21, %s2754_s6  ;;  %v1595_v15 = vrot.slane %v1594_v6, 4  ;;  %v1599_v16 = vrot.slane %v1597_v7, 5 }
 0x142   : > { %v1517_v27 = vpop.permute.xlu1 %1516  ;;  %2630 = vmatpush.bf16.msra.mxu1 %v2629_v10 }
 0x143   : > { %1522 = vst.msk [vmem:[#allocation2 + $0x34] sm:$0xf] %vm1497_vm12, %v1517_v27  ;;  %v1515_v31 = vpop.permute.xlu0 %1514  ;;  %v1957_v33 = vpop.permute.xlu2 %1956  ;;  %v1600_v28 = vsel %vm2841_vm2, %v1595_v15, %v1599_v16  ;;  %v2627_v15 = vld [vmem:[%s3671_s3 + $0x28] sm:$0xff] }
 0x144   : > { %1521 = vst.msk [vmem:[#allocation2 + $0x30] sm:$0xf] %vm1497_vm12, %v1515_v31  ;;  %v2514_v31 = vld [vmem:[%s2830_s8 + $0x28] sm:$0xf] }
 0x145   : > { %1780 = vst.msk [vmem:[#allocation2 + $0x34] sm:$0xf] %vm1733_vm13, %v1776_v14  ;;  %v1629_v14 = vshll.u32 %v2501_v4, 16  ;;  %v1861_v38 = vrot.slane %v2514_v31, 5 }
 0x147   : > { %v1631_v24 = vrot.slane %v1629_v14, 5 }
 0x148   : > { %1362 = vrot.lane.b32.xlu1 %v1319_v34, %s2752_s29  ;;  %v2487_v34 = vld [vmem:[%s2830_s8 + $0x40] sm:$0xf] }
 0x149   : > { %1979 = vrot.lane.b32.xlu0 %v1976_v36, %s2755_s7  ;;  %1977 = vrot.lane.b32.xlu2 %v1973_v40, %s2755_s7  ;;  %v1632_v35 = vor.u32 %v1631_v24, %v1628_v23  ;;  %v2529_v36 = vrot.slane %v2513_v29, 9  ;;  %v1643_v40 = vrot.slane %v1642_v32, 4  ;;  %v2622_v29 = vld [vmem:[%s3671_s3] sm:$0xff] }
 0x14a   : > { %v1774_v44 = vpop.permute.xlu1 %1773 }
 0x14b   : > { %1779 = vst.msk [vmem:[#allocation2 + $0x30] sm:$0xf] %vm1733_vm13, %v1774_v44  ;;  %v1716_v46 = vpop.permute.xlu0 %1715  ;;  %v1361_v50 = vpop.permute.xlu2 %1360  ;;  %v1633_v44 = vrot.slane %v1632_v35, 4  ;;  %v1862_v37 = vsel %vm2909_vm5, %v2529_v36, %v1861_v38 }
 0x14c   : > { %1743 = vst.msk [vmem:[#allocation2 + $0x24] sm:$0xf] %vm1733_vm13, %v1716_v46  ;;  %v1875_v46 = vrot.slane %v2520_v42, 5 }
 0x14d   : > { %1962 = vst.msk [vmem:[#allocation2 + $0x30] sm:$0xf] %vm1930_vm15, %v1957_v33  ;;  %v1645_v33 = vshll.u32 %v2503_v22, 16  ;;  %v2624_v22 = vld [vmem:[%s3671_s3 + $0x10] sm:$0xff] }
 0x14e   : > { %1998 = vst.msk [vmem:[#allocation2 + $0x30] sm:$0xf] %vm1985_vm14, %v2756_v55  ;;  %v1877_v52 = vrot.slane %v1875_v46, 4 }
 0x14f   : > { %1402 = vst.msk [vmem:[#allocation2 + $0x4] sm:$0xf] %vm1400_vm11, %v1361_v50  ;;  %v1647_v41 = vrot.slane %v1645_v33, 5  ;;  %v1638_v50 = vsel %vm2841_vm2, %v1633_v44, %v1637_v19 }
 0x150   : > { %1372 = vrot.lane.b32.xlu1 %v1336_v51, %s2752_s29  ;;  %v2515_v51 = vld [vmem:[%s2830_s8 + $0x2c] sm:$0x1]  ;;  %v1879_v60 = vsel %vm2909_vm5, %v1877_v52, %v1878_v53  ;;  %s393_s8 = sadd.s32 %s2406_s14, %s2405_s13 }
 0x151   : > { %1370 = vrot.lane.b32.xlu0 %v1333_v54, %s2752_s29  ;;  %1364 = vrot.lane.b32.xlu2 %v1322_v58, %s2752_s29  ;;  %v1648_v47 = vsel %vm2841_vm2, %v1643_v40, %v1647_v41  ;;  %v1863_v58 = vrot.slane %v1861_v38, 4  ;;  %v1864_v59 = vrot.slane %v2515_v51, 5  ;;  %s2407_s17 = sshll.u32 %s393_s8, 3 }
 0x152   : > { %v1913_v61 = vpop.permute.xlu1 %1912  ;;  %s3607_s18 = scalar_lea.vmem %s3673_s5, %s2407_s17 }
 0x153   : > { %1940 = vst.msk [vmem:[#allocation2 + $0x24] sm:$0xf] %vm1930_vm15, %v1913_v61  ;;  %v1911_v1 = vpop.permute.xlu0 %1910  ;;  %v1462_v3 = vpop.permute.xlu2 %1461  ;;  %v1876_v61 = vsel %vm2909_vm5, %v2531_v56, %v1875_v46  ;;  %v1865_v62 = vsel %vm2909_vm5, %v1863_v58, %v1864_v59  ;;  %v3598_v59 = vld [vmem:[%s3672_s4] ss:$0 sm:$0xff] }
 0x154   : > { %1995 = vst.msk [vmem:[#allocation2 + $0x24] sm:$0xf] %vm1985_vm14, %v2756_v55 }
 0x155   : > { %1939 = vst.msk [vmem:[#allocation2 + $0x20] sm:$0xf] %vm1930_vm15, %v1911_v1 }
 0x156   : > { %1994 = vst.msk [vmem:[#allocation2 + $0x20] sm:$0xf] %vm1985_vm14, %v2756_v55 }
 0x158   : > { %1473 = vrot.lane.b32.xlu1 %v2486_v5, %s2753_s30 }
 0x159   : > { %1467 = vrot.lane.b32.xlu0 %v2483_v8, %s2753_s30  ;;  %1465 = vrot.lane.b32.xlu2 %v2482_v12, %s2753_s30  ;;  %v2628_v12 = vld [vmem:[%s3671_s3 + $0x30] sm:$0xff] }
 0x15a   : > { %v1359_v17 = vpop.permute.xlu1 %1358  ;;  %2634 = vmatpush.bf16.msra.mxu2 %v2628_v12  ;;  %2635 = vmatpush.bf16.msra.mxu3 %v2628_v12 }
 0x15b   : > { %1401 = vst.msk [vmem:[#allocation2] sm:$0xf] %vm1400_vm11, %v1359_v17  ;;  %v1959_v21 = vpop.permute.xlu0 %1958  ;;  %v1472_v27 = vpop.permute.xlu2 %1471  ;;  %2135 = vmatpush.bf16.msra.mxu0 %v2628_v12  ;;  %2633 = vmatpush.bf16.msra.mxu1 %v2628_v12  ;;  %v2626_v17 = vld [vmem:[%s3671_s3 + $0x20] sm:$0xff] }
 0x15c   : > { %1963 = vst.msk [vmem:[#allocation2 + $0x34] sm:$0xf] %vm1930_vm15, %v1959_v21 }
 0x15d   : > { %1999 = vst.msk [vmem:[#allocation2 + $0x34] sm:$0xf] %vm1985_vm14, %v2756_v55  ;;  %v2618_v32 = vld [vmem:[#allocation2 + $0x20] sm:$0xff] }
 0x15e   : > { %1498 = vst.msk [vmem:[#allocation2] sm:$0xf] %vm1497_vm12, %v1462_v3  ;;  %2637 = vmatpush.bf16.msra.mxu2 %v2627_v15  ;;  %2638 = vmatpush.bf16.msra.mxu3 %v2627_v15 }
 0x15f   : > { %2136 = vmatpush.bf16.msra.mxu0 %v2627_v15  ;;  %2636 = vmatpush.bf16.msra.mxu1 %v2627_v15 }
 0x160   : > { %1703 = vrot.lane.b32.xlu1 %v1600_v28, %s2754_s6 }
 0x161   : > { %1701 = vrot.lane.b32.xlu0 %v1590_v30, %s2754_s6  ;;  %1475 = vrot.lane.b32.xlu2 %v2487_v34, %s2753_s30 }
 0x162   : > { %v1369_v39 = vpop.permute.xlu1 %1368  ;;  %2640 = vmatpush.bf16.msra.mxu2 %v2626_v17  ;;  %2641 = vmatpush.bf16.msra.mxu3 %v2626_v17 }
 0x163   : > { %1406 = vst.msk [vmem:[#allocation2 + $0x14] sm:$0xf] %vm1400_vm11, %v1369_v39  ;;  %v1367_v43 = vpop.permute.xlu0 %1366  ;;  %v1706_v45 = vpop.permute.xlu2 %1705  ;;  %2137 = vmatpush.bf16.msra.mxu0 %v2626_v17  ;;  %2639 = vmatpush.bf16.msra.mxu1 %v2626_v17 }
 0x164   : > { %1405 = vst.msk [vmem:[#allocation2 + $0x10] sm:$0xf] %vm1400_vm11, %v1367_v43  ;;  %v2620_v33 = vld [vmem:[#allocation2 + $0x30] sm:$0xff] }
 0x165   : > { %1503 = vst.msk [vmem:[#allocation2 + $0x14] sm:$0xf] %vm1497_vm12, %v1472_v27  ;;  %v2623_v27 = vld [vmem:[%s3671_s3 + $0x8] sm:$0xff] }
 0x166   : > { %2643 = vmatpush.bf16.msra.mxu2 %v2625_v20  ;;  %2644 = vmatpush.bf16.msra.mxu3 %v2625_v20 }
 0x167   : > { %2138 = vmatpush.bf16.msra.mxu0 %v2625_v20  ;;  %2642 = vmatpush.bf16.msra.mxu1 %v2625_v20 }
 0x168   : > { %1898 = vrot.lane.b32.xlu1 %v1862_v37, %s2755_s7 }
 0x169   : > { %1711 = vrot.lane.b32.xlu0 %v1648_v47, %s2754_s6  ;;  %1709 = vrot.lane.b32.xlu2 %v1638_v50, %s2754_s6 }
 0x16a   : > { %v1470_v54 = vpop.permute.xlu1 %1469  ;;  %2646 = vmatpush.bf16.msra.mxu2 %v2624_v22  ;;  %2647 = vmatpush.bf16.msra.mxu3 %v2624_v22 }
 0x16b   : > { %1502 = vst.msk [vmem:[#allocation2 + $0x10] sm:$0xf] %vm1497_vm12, %v1470_v54  ;;  %v1464_v57 = vpop.permute.xlu0 %1463  ;;  %v1897_v25 = vpop.permute.xlu2 %1896  ;;  %2139 = vmatpush.bf16.msra.mxu0 %v2624_v22  ;;  %2645 = vmatpush.bf16.msra.mxu1 %v2624_v22 }
 0x16c   : > { %1499 = vst.msk [vmem:[#allocation2 + $0x4] sm:$0xf] %vm1497_vm12, %v1464_v57 }
 0x16d   : > { %1738 = vst.msk [vmem:[#allocation2 + $0x10] sm:$0xf] %vm1733_vm13, %v1706_v45 }
 0x16e   : > { %2649 = vmatpush.bf16.msra.mxu2 %v2623_v27  ;;  %2650 = vmatpush.bf16.msra.mxu3 %v2623_v27 }
 0x16f   : > { %2140 = vmatpush.bf16.msra.mxu0 %v2623_v27  ;;  %2648 = vmatpush.bf16.msra.mxu1 %v2623_v27 }
 0x170   : > { %1908 = vrot.lane.b32.xlu1 %v1879_v60, %s2755_s7 }
 0x171   : > { %1906 = vrot.lane.b32.xlu0 %v1876_v61, %s2755_s7  ;;  %1900 = vrot.lane.b32.xlu2 %v1865_v62, %s2755_s7 }
 0x172   : > { %v1700_v63 = vpop.permute.xlu1 %1699  ;;  %2652 = vmatpush.bf16.msra.mxu2 %v2622_v29  ;;  %2653 = vmatpush.bf16.msra.mxu3 %v2622_v29 }
 0x173   : > { %1735 = vst.msk [vmem:[#allocation2 + $0x4] sm:$0xf] %vm1733_vm13, %v1700_v63  ;;  %v1698_v0 = vpop.permute.xlu0 %1697  ;;  %v1196_v1 = vpop.permute.xlu2 %1195  ;;  %2141 = vmatpush.bf16.msra.mxu0 %v2622_v29  ;;  %2651 = vmatpush.bf16.msra.mxu1 %v2622_v29 }
 0x174   : > { %1734 = vst.msk [vmem:[#allocation2] sm:$0xf] %vm1733_vm13, %v1698_v0 }
 0x175   : > { %1932 = vst.msk [vmem:[#allocation2 + $0x4] sm:$0xf] %vm1930_vm15, %v1897_v25  ;;  %2162 = vmatmul.bf16.vlgmr.msra.gmra.mxu2 %v2618_v32  ;;  %2172 = vmatmul.bf16.vlgmr.msra.gmra.mxu3 %v2620_v33 }
 0x176   : > { %1987 = vst.msk [vmem:[#allocation2 + $0x4] sm:$0xf] %vm1985_vm14, %v2756_v55 }
 0x177   : > { %1228 = vst.msk [vmem:[#allocation2 + $0x28] sm:$0xf] %vm1217_vm10, %v1196_v1 }
 0x17a   : > { %v1895_v26 = vpop.permute.xlu1 %1894 }
 0x17b   : > { %1931 = vst.msk [vmem:[#allocation2] sm:$0xf] %vm1930_vm15, %v1895_v26  ;;  %v1708_v2 = vpop.permute.xlu0 %1707  ;;  %v1262_v3 = vpop.permute.xlu2 %1261 }
 0x17c   : > { %1986 = vst.msk [vmem:[#allocation2] sm:$0xf] %vm1985_vm14, %v2756_v55 }
 0x17d   : > { %1739 = vst.msk [vmem:[#allocation2 + $0x14] sm:$0xf] %vm1733_vm13, %v1708_v2 }
 0x17e   : > { %1266 = vst.msk [vmem:[#allocation2 + $0x3c] sm:$0xf] %vm1217_vm10, %v1262_v3 }
 0x182   : > { %v1905_v4 = vpop.permute.xlu1 %1904 }
 0x183   : > { %1936 = vst.msk [vmem:[#allocation2 + $0x14] sm:$0xf] %vm1930_vm15, %v1905_v4  ;;  %v1903_v5 = vpop.permute.xlu0 %1902  ;;  %v1429_v6 = vpop.permute.xlu2 %1428  ;;  %v2614_v36 = vld [vmem:[#allocation2] sm:$0xff] }
 0x184   : > { %1991 = vst.msk [vmem:[#allocation2 + $0x14] sm:$0xf] %vm1985_vm14, %v2756_v55  ;;  %2142 = vmatmul.bf16.vlgmr.msra.gmra.mxu0 %v2614_v36 }
 0x185   : > { %1935 = vst.msk [vmem:[#allocation2 + $0x10] sm:$0xf] %vm1930_vm15, %v1903_v5 }
 0x186   : > { %1990 = vst.msk [vmem:[#allocation2 + $0x10] sm:$0xf] %vm1985_vm14, %v2756_v55 }
 0x18a   : > { %v1260_v7 = vpop.permute.xlu1 %1259 }
 0x18b   : > { %1265 = vst.msk [vmem:[#allocation2 + $0x38] sm:$0xf] %vm1217_vm10, %v1260_v7  ;;  %v1198_v8 = vpop.permute.xlu0 %1197  ;;  %v1484_v9 = vpop.permute.xlu2 %1483 }
 0x18c   : > { %1229 = vst.msk [vmem:[#allocation2 + $0x2c] sm:$0xf] %vm1217_vm10, %v1198_v8 }
 0x18d   : > { %1434 = vst.msk [vmem:[#allocation2 + $0x38] sm:$0xf] %vm1400_vm11, %v1429_v6  ;;  %v2616_v38 = vld [vmem:[#allocation2 + $0x10] sm:$0xff] }
 0x18e   : > { %2152 = vmatmul.bf16.vlgmr.msra.gmra.mxu1 %v2616_v38 }
 0x192   : > { %v1381_v11 = vpop.permute.xlu1 %1380 }
 0x193   : > { %1412 = vst.msk [vmem:[#allocation2 + $0x2c] sm:$0xf] %vm1400_vm11, %v1381_v11  ;;  %v1379_v13 = vpop.permute.xlu0 %1378  ;;  %v1718_v14 = vpop.permute.xlu2 %1717 }
 0x194   : > { %1411 = vst.msk [vmem:[#allocation2 + $0x28] sm:$0xf] %vm1400_vm11, %v1379_v13 }
 0x195   : > { %1509 = vst.msk [vmem:[#allocation2 + $0x2c] sm:$0xf] %vm1497_vm12, %v1484_v9 }
 0x19a   : > { %v1482_v16 = vpop.permute.xlu1 %1481 }
 0x19b   : > { %1508 = vst.msk [vmem:[#allocation2 + $0x28] sm:$0xf] %vm1497_vm12, %v1482_v16  ;;  %v1431_v18 = vpop.permute.xlu0 %1430  ;;  %v1811_v19 = vpop.permute.xlu2 %1810 }
 0x19c   : > { %1435 = vst.msk [vmem:[#allocation2 + $0x3c] sm:$0xf] %vm1400_vm11, %v1431_v18 }
 0x19d   : > { %1744 = vst.msk [vmem:[#allocation2 + $0x28] sm:$0xf] %vm1733_vm13, %v1718_v14 }
 0x1a2   : > { %v1530_v21 = vpop.permute.xlu1 %1529 }
 0x1a3   : > { %1534 = vst.msk [vmem:[#allocation2 + $0x3c] sm:$0xf] %vm1497_vm12, %v1530_v21  ;;  %v1528_v23 = vpop.permute.xlu0 %1527  ;;  %v1978_v24 = vpop.permute.xlu2 %1977 }
 0x1a4   : > { %1533 = vst.msk [vmem:[#allocation2 + $0x38] sm:$0xf] %vm1497_vm12, %v1528_v23 }
 0x1a5   : > { %1815 = vst.msk [vmem:[#allocation2 + $0x3c] sm:$0xf] %vm1733_vm13, %v1811_v19 }
 0x1aa   : > { %v1809_v28 = vpop.permute.xlu1 %1808 }
 0x1ab   : > { %1814 = vst.msk [vmem:[#allocation2 + $0x38] sm:$0xf] %vm1733_vm13, %v1809_v28  ;;  %v1720_v30 = vpop.permute.xlu0 %1719  ;;  %v1365_v31 = vpop.permute.xlu2 %1364 }
 0x1ac   : > { %1745 = vst.msk [vmem:[#allocation2 + $0x2c] sm:$0xf] %vm1733_vm13, %v1720_v30 }
 0x1ad   : > { %1983 = vst.msk [vmem:[#allocation2 + $0x38] sm:$0xf] %vm1930_vm15, %v1978_v24 }
 0x1ae   : > { %2000 = vst.msk [vmem:[#allocation2 + $0x38] sm:$0xf] %vm1985_vm14, %v2756_v55 }
 0x1af   : > { %1404 = vst.msk [vmem:[#allocation2 + $0xc] sm:$0xf] %vm1400_vm11, %v1365_v31 }
 0x1b2   : > { %v1917_v34 = vpop.permute.xlu1 %1916 }
 0x1b3   : > { %1942 = vst.msk [vmem:[#allocation2 + $0x2c] sm:$0xf] %vm1930_vm15, %v1917_v34  ;;  %v1915_v35 = vpop.permute.xlu0 %1914  ;;  %v1466_v39 = vpop.permute.xlu2 %1465 }
 0x1b4   : > { %1997 = vst.msk [vmem:[#allocation2 + $0x2c] sm:$0xf] %vm1985_vm14, %v2756_v55 }
 0x1b5   : > { %1941 = vst.msk [vmem:[#allocation2 + $0x28] sm:$0xf] %vm1930_vm15, %v1915_v35 }
 0x1b6   : > { %1996 = vst.msk [vmem:[#allocation2 + $0x28] sm:$0xf] %vm1985_vm14, %v2756_v55 }
 0x1ba   : > { %v1363_v40 = vpop.permute.xlu1 %1362 }
 0x1bb   : > { %1403 = vst.msk [vmem:[#allocation2 + $0x8] sm:$0xf] %vm1400_vm11, %v1363_v40  ;;  %v1980_v41 = vpop.permute.xlu0 %1979  ;;  %v1476_v43 = vpop.permute.xlu2 %1475 }
 0x1bc   : > { %1984 = vst.msk [vmem:[#allocation2 + $0x3c] sm:$0xf] %vm1930_vm15, %v1980_v41 }
 0x1bd   : > { %2001 = vst.msk [vmem:[#allocation2 + $0x3c] sm:$0xf] %vm1985_vm14, %v2756_v55  ;;  %v2619_v42 = vld [vmem:[#allocation2 + $0x28] sm:$0xff] }
 0x1be   : > { %1500 = vst.msk [vmem:[#allocation2 + $0x8] sm:$0xf] %vm1497_vm12, %v1466_v39  ;;  %2167 = vmatmul.bf16.gmra.mxu2 %v2619_v42 }
 0x1c2   : > { %v1373_v44 = vpop.permute.xlu1 %1372 }
 0x1c3   : > { %1408 = vst.msk [vmem:[#allocation2 + $0x1c] sm:$0xf] %vm1400_vm11, %v1373_v44  ;;  %v1371_v45 = vpop.permute.xlu0 %1370  ;;  %v1710_v46 = vpop.permute.xlu2 %1709 }
 0x1c4   : > { %1407 = vst.msk [vmem:[#allocation2 + $0x18] sm:$0xf] %vm1400_vm11, %v1371_v45  ;;  %v2621_v37 = vld [vmem:[#allocation2 + $0x38] sm:$0xff] }
 0x1c5   : > { %1505 = vst.msk [vmem:[#allocation2 + $0x1c] sm:$0xf] %vm1497_vm12, %v1476_v43  ;;  %2177 = vmatmul.bf16.gmra.mxu3 %v2621_v37 }
 0x1ca   : > { %v1474_v47 = vpop.permute.xlu1 %1473 }
 0x1cb   : > { %1504 = vst.msk [vmem:[#allocation2 + $0x18] sm:$0xf] %vm1497_vm12, %v1474_v47  ;;  %v1468_v48 = vpop.permute.xlu0 %1467  ;;  %v1901_v50 = vpop.permute.xlu2 %1900 }
 0x1cc   : > { %1501 = vst.msk [vmem:[#allocation2 + $0xc] sm:$0xf] %vm1497_vm12, %v1468_v48 }
 0x1cd   : > { %1740 = vst.msk [vmem:[#allocation2 + $0x18] sm:$0xf] %vm1733_vm13, %v1710_v46 }
 0x1d2   : > { %v1704_v49 = vpop.permute.xlu1 %1703 }
 0x1d3   : > { %1737 = vst.msk [vmem:[#allocation2 + $0xc] sm:$0xf] %vm1733_vm13, %v1704_v49  ;;  %v1702_v51 = vpop.permute.xlu0 %1701 }
 0x1d4   : > { %1736 = vst.msk [vmem:[#allocation2 + $0x8] sm:$0xf] %vm1733_vm13, %v1702_v51 }
 0x1d5   : > { %1934 = vst.msk [vmem:[#allocation2 + $0xc] sm:$0xf] %vm1930_vm15, %v1901_v50 }
 0x1d6   : > { %1989 = vst.msk [vmem:[#allocation2 + $0xc] sm:$0xf] %vm1985_vm14, %v2756_v55 }
 0x1da   : > { %v1899_v52 = vpop.permute.xlu1 %1898 }
 0x1db   : > { %1933 = vst.msk [vmem:[#allocation2 + $0x8] sm:$0xf] %vm1930_vm15, %v1899_v52  ;;  %v1712_v53 = vpop.permute.xlu0 %1711 }
 0x1dc   : > { %1988 = vst.msk [vmem:[#allocation2 + $0x8] sm:$0xf] %vm1985_vm14, %v2756_v55 }
 0x1dd   : > { %1741 = vst.msk [vmem:[#allocation2 + $0x1c] sm:$0xf] %vm1733_vm13, %v1712_v53 }
 0x1e2   : > { %v1909_v54 = vpop.permute.xlu1 %1908 }
 0x1e3   : > { %1938 = vst.msk [vmem:[#allocation2 + $0x1c] sm:$0xf] %vm1930_vm15, %v1909_v54  ;;  %v1907_v56 = vpop.permute.xlu0 %1906  ;;  %v2615_v57 = vld [vmem:[#allocation2 + $0x8] sm:$0xff] }
 0x1e4   : > { %1993 = vst.msk [vmem:[#allocation2 + $0x1c] sm:$0xf] %vm1985_vm14, %v2756_v55  ;;  %2147 = vmatmul.bf16.gmra.mxu0 %v2615_v57 }
 0x1e5   : > { %1937 = vst.msk [vmem:[#allocation2 + $0x18] sm:$0xf] %vm1930_vm15, %v1907_v56 }
 0x1e6   : > { %1992 = vst.msk [vmem:[#allocation2 + $0x18] sm:$0xf] %vm1985_vm14, %v2756_v55 }
 0x1ed   : > { %v2617_v58 = vld [vmem:[#allocation2 + $0x18] sm:$0xff] }
 0x1ee   : > { %2157 = vmatmul.bf16.gmra.mxu1 %v2617_v58 }
 0x1f8   : > { %v2163_v55 = vpop.f32.mrf.mxu2  ;;  %v2173_v63 = vpop.f32.mrf.mxu3 }
 0x1f9   : > { %v2164_v0 = vadd.f32 %v3598_v59, %v2163_v55  ;;  %v2174_v1 = vadd.f32 %v3598_v59, %v2173_v63 }
 0x1fb   : > { %vm2191_vm3 = vcmp.gt.f32.partialorder %v2164_v0, 0.0  ;;  %v2207_v3 = vmul.f32 0.1, %v2164_v0  ;;  %vm2195_vm4 = vcmp.gt.f32.partialorder %v2174_v1, 0.0  ;;  %v2211_v4 = vmul.f32 0.1, %v2174_v1 }
 0x1fd   : > { %v2223_v7 = vsel %vm2191_vm3, %v2164_v0, %v2207_v3  ;;  %v2227_v8 = vsel %vm2195_vm4, %v2174_v1, %v2211_v4 }
 0x1fe   : > { %2240 = vst.msk [vmem:[%s3607_s18 + $0x40] sm:$0xff] %vm2231_vm0, %v2223_v7 }
 0x1ff   : > { %2244 = vst.msk [vmem:[%s3607_s18 + $0x60] sm:$0xff] %vm2231_vm0, %v2227_v8 }
 0x200   : > { %v2165_v13 = vpop.f32.mrf.mxu2  ;;  %v2175_v14 = vpop.f32.mrf.mxu3 }
 0x201   : > { %v2143_v25 = vpop.f32.mrf.mxu0  ;;  %v2166_v15 = vadd.f32 %v3598_v59, %v2165_v13  ;;  %v2176_v16 = vadd.f32 %v3598_v59, %v2175_v14 }
 0x202   : > { %v2144_v61 = vadd.f32 %v3598_v59, %v2143_v25 }
 0x203   : > { %vm2192_vm7 = vcmp.gt.f32.partialorder %v2166_v15, 0.0  ;;  %v2208_v19 = vmul.f32 0.1, %v2166_v15  ;;  %vm2196_vm8 = vcmp.gt.f32.partialorder %v2176_v16, 0.0  ;;  %v2212_v20 = vmul.f32 0.1, %v2176_v16 }
 0x204   : > { %vm2183_vm1 = vcmp.gt.f32.partialorder %v2144_v61, 0.0  ;;  %v2199_v26 = vmul.f32 0.1, %v2144_v61 }
 0x205   : > { %v2224_v23 = vsel %vm2192_vm7, %v2166_v15, %v2208_v19  ;;  %v2228_v24 = vsel %vm2196_vm8, %v2176_v16, %v2212_v20 }
 0x206   : > { %v2215_v5 = vsel %vm2183_vm1, %v2144_v61, %v2199_v26  ;;  %2241 = vst.msk [vmem:[%s3607_s18 + $0x48] sm:$0xff] %vm2231_vm0, %v2224_v23 }
 0x207   : > { %2232 = vst.msk [vmem:[%s3607_s18] sm:$0xff] %vm2231_vm0, %v2215_v5 }
 0x208   : > { %2245 = vst.msk [vmem:[%s3607_s18 + $0x68] sm:$0xff] %vm2231_vm0, %v2228_v24 }
 0x209   : > { %v2145_v9 = vpop.f32.mrf.mxu0 }
 0x20a   : > { %v2146_v11 = vadd.f32 %v3598_v59, %v2145_v9 }
 0x20b   : > { %v2153_v60 = vpop.f32.mrf.mxu1 }
 0x20c   : > { %v2154_v62 = vadd.f32 %v3598_v59, %v2153_v60  ;;  %vm2184_vm5 = vcmp.gt.f32.partialorder %v2146_v11, 0.0  ;;  %v2200_v17 = vmul.f32 0.1, %v2146_v11 }
 0x20e   : > { %vm2187_vm2 = vcmp.gt.f32.partialorder %v2154_v62, 0.0  ;;  %v2203_v2 = vmul.f32 0.1, %v2154_v62  ;;  %v2216_v21 = vsel %vm2184_vm5, %v2146_v11, %v2200_v17 }
 0x20f   : > { %2233 = vst.msk [vmem:[%s3607_s18 + $0x8] sm:$0xff] %vm2231_vm0, %v2216_v21 }
 0x210   : > { %v2219_v6 = vsel %vm2187_vm2, %v2154_v62, %v2203_v2 }
 0x211   : > { %2236 = vst.msk [vmem:[%s3607_s18 + $0x20] sm:$0xff] %vm2231_vm0, %v2219_v6 }
 0x213   : > { %v2155_v10 = vpop.f32.mrf.mxu1 }
 0x214   : > { %v2156_v12 = vadd.f32 %v3598_v59, %v2155_v10 }
 0x216   : > { %vm2188_vm6 = vcmp.gt.f32.partialorder %v2156_v12, 0.0  ;;  %v2204_v18 = vmul.f32 0.1, %v2156_v12 }
 0x218   : > { %v2220_v22 = vsel %vm2188_vm6, %v2156_v12, %v2204_v18 }
 0x219   : > { %2237 = vst.msk [vmem:[%s3607_s18 + $0x28] sm:$0xff] %vm2231_vm0, %v2220_v22 }
 0x241   : > { %v2168_v27 = vpop.f32.mrf.mxu2 }
 0x242   : > { %v2169_v28 = vadd.f32 %v3598_v59, %v2168_v27 }
 0x244   : > { %vm2193_vm9 = vcmp.gt.f32.partialorder %v2169_v28, 0.0  ;;  %v2209_v29 = vmul.f32 0.1, %v2169_v28 }
 0x246   : > { %v2225_v30 = vsel %vm2193_vm9, %v2169_v28, %v2209_v29 }
 0x247   : > { %2242 = vst.msk [vmem:[%s3607_s18 + $0x50] sm:$0xff] %vm2231_vm0, %v2225_v30 }
 0x248   : > { %v2178_v31 = vpop.f32.mrf.mxu3 }
 0x249   : > { %v2179_v32 = vadd.f32 %v3598_v59, %v2178_v31  ;;  %v2170_v33 = vpop.f32.mrf.mxu2 }
 0x24a   : > { %v2171_v35 = vadd.f32 %v3598_v59, %v2170_v33 }
 0x24b   : > { %vm2197_vm10 = vcmp.gt.f32.partialorder %v2179_v32, 0.0  ;;  %v2213_v34 = vmul.f32 0.1, %v2179_v32 }
 0x24c   : > { %vm2194_vm11 = vcmp.gt.f32.partialorder %v2171_v35, 0.0  ;;  %v2210_v38 = vmul.f32 0.1, %v2171_v35 }
 0x24d   : > { %v2229_v36 = vsel %vm2197_vm10, %v2179_v32, %v2213_v34 }
 0x24e   : > { %2246 = vst.msk [vmem:[%s3607_s18 + $0x70] sm:$0xff] %vm2231_vm0, %v2229_v36  ;;  %v2226_v39 = vsel %vm2194_vm11, %v2171_v35, %v2210_v38 }
 0x24f   : > { %2243 = vst.msk [vmem:[%s3607_s18 + $0x58] sm:$0xff] %vm2231_vm0, %v2226_v39 }
 0x250   : > { %v2180_v40 = vpop.f32.mrf.mxu3 }
 0x251   : > { %v2181_v41 = vadd.f32 %v3598_v59, %v2180_v40 }
 0x253   : > { %vm2198_vm12 = vcmp.gt.f32.partialorder %v2181_v41, 0.0  ;;  %v2214_v42 = vmul.f32 0.1, %v2181_v41 }
 0x255   : > { %v2230_v43 = vsel %vm2198_vm12, %v2181_v41, %v2214_v42 }
 0x256   : > { %2247 = vst.msk [vmem:[%s3607_s18 + $0x78] sm:$0xff] %vm2231_vm0, %v2230_v43 }
 0x261   : > { %v2148_v44 = vpop.f32.mrf.mxu0 }
 0x262   : > { %v2149_v45 = vadd.f32 %v3598_v59, %v2148_v44 }
 0x264   : > { %vm2185_vm13 = vcmp.gt.f32.partialorder %v2149_v45, 0.0  ;;  %v2201_v37 = vmul.f32 0.1, %v2149_v45 }
 0x266   : > { %v2217_v46 = vsel %vm2185_vm13, %v2149_v45, %v2201_v37 }
 0x267   : > { %2234 = vst.msk [vmem:[%s3607_s18 + $0x10] sm:$0xff] %vm2231_vm0, %v2217_v46 }
 0x269   : > { %v2150_v47 = vpop.f32.mrf.mxu0 }
 0x26a   : > { %v2151_v48 = vadd.f32 %v3598_v59, %v2150_v47 }
 0x26b   : > { %v2158_v49 = vpop.f32.mrf.mxu1 }
 0x26c   : > { %vm2186_vm14 = vcmp.gt.f32.partialorder %v2151_v48, 0.0  ;;  %v2202_v50 = vmul.f32 0.1, %v2151_v48  ;;  %v2159_v51 = vadd.f32 %v3598_v59, %v2158_v49 }
 0x26e   : > { %v2218_v52 = vsel %vm2186_vm14, %v2151_v48, %v2202_v50  ;;  %vm2189_vm15 = vcmp.gt.f32.partialorder %v2159_v51, 0.0  ;;  %v2205_v53 = vmul.f32 0.1, %v2159_v51 }
 0x26f   : > { %2235 = vst.msk [vmem:[%s3607_s18 + $0x18] sm:$0xff] %vm2231_vm0, %v2218_v52 }
 0x270   : > { %v2221_v54 = vsel %vm2189_vm15, %v2159_v51, %v2205_v53 }
 0x271   : > { %2238 = vst.msk [vmem:[%s3607_s18 + $0x30] sm:$0xff] %vm2231_vm0, %v2221_v54 }
 0x273   : > { %v2160_v56 = vpop.f32.mrf.mxu1 }
 0x274   : > { %v2161_v57 = vadd.f32 %v3598_v59, %v2160_v56 }
 0x276   : > { %vm2190_vm1 = vcmp.gt.f32.partialorder %v2161_v57, 0.0  ;;  %v2206_v58 = vmul.f32 0.1, %v2161_v57 }
 0x278   : > { %v2222_v25 = vsel %vm2190_vm1, %v2161_v57, %v2206_v58 }
 0x279   : > { %2239 = vst.msk [vmem:[%s3607_s18 + $0x38] sm:$0xff] %vm2231_vm0, %v2222_v25 }
 0x27a PF: > { %s15_s22 = sadd.s32 1, %s2746_s22   ;;  %s3678_s18 = smov %s2738_s20 }
 0x27b   : > { %p12_p10 = scmp.ge.s32.totalorder %s15_s22, 6   ;;  %s3679_s19 = smov %s2742_s21 }
 0x27c   : > { %s3680_s20 = smov %s3683_s23  ;;  %s3681_s21 = smov %s3687_s24 }
 0x27d   :  { %14 = sbr.rel (!%p12_p10) target bundleno = 3 (0x3), region = 80 }

</bundles_post_ra>
